<compile_context>
chip_gen: v7x
topology: tpu7x:2x2x1
jax: 0.10.0
libtpu: 0.0.40
codegen_flags: <defaults>
</compile_context>

<pallas_src>
import jax
import jax.numpy as jnp
import numpy as np
from jax.experimental import pallas as pl
from jax.experimental.pallas import tpu as pltpu

# Weight dtype fed to the MXU matmuls. Set to jnp.bfloat16 on v6e/v7x at
# realistic hidden sizes (accumulation stays f32 via preferred_element_type);
# kept f32 here for bit-faithful parity with the PyTorch reference.
MATMUL_DTYPE = jnp.float32
_VMEM_LIMIT = 32 * 1024 * 1024  # explicit, safe on v5e/v6e/v7x


# ------------------------- hoisted input projection ---------------------------
def _inproj_kernel(x_ref, w_ref, b_ref, o_ref):
    """Input projection for one M-tile of rows (rows = flattened (t, b)).

    x_ref: (bm, D); w_ref: (D, 4H) = W_ih^T (gate order i|f|g|o);
    b_ref: (1, 4H) = b_ih + b_hh; o_ref: (4, bm, H) per-gate pre-activations.
    The gate split is paid ONCE here (parallel), not per-step in the recurrence.
    """
    y = (jnp.dot(x_ref[...].astype(w_ref.dtype), w_ref[...],
                 preferred_element_type=jnp.float32)
         + b_ref[...])
    h = o_ref.shape[2]
    for g in range(4):
        o_ref[g] = y[:, g * h:(g + 1) * h]


def _input_projection(x_flat, w_ih_t, bias):
    """(M, D) @ (D, 4H) + b  ->  (4, M, H) per-gate pre-activations."""
    M, D = x_flat.shape
    four_h = w_ih_t.shape[1]
    H = four_h // 4
    block_m = M if M <= 512 else 512
    return pl.pallas_call(
        _inproj_kernel,
        out_shape=jax.ShapeDtypeStruct((4, M, H), jnp.float32),
        grid_spec=pltpu.PrefetchScalarGridSpec(
            num_scalar_prefetch=0,
            grid=(pl.cdiv(M, block_m),),
            in_specs=[
                pl.BlockSpec((block_m, D), lambda i: (i, 0)),
                pl.BlockSpec((D, four_h), lambda i: (0, 0)),
                pl.BlockSpec((1, four_h), lambda i: (0, 0)),
            ],
            out_specs=pl.BlockSpec((4, block_m, H), lambda i: (0, i, 0)),
        ),
        compiler_params=pltpu.CompilerParams(
            dimension_semantics=("parallel",),
            vmem_limit_bytes=_VMEM_LIMIT),
    )(x_flat, w_ih_t, bias)


# ----------------------------- LSTM recurrence --------------------------------
def _lstm_recurrence_kernel(xproj_ref, whh_ref, out_ref, h_ref, c_ref):
    """Sequential LSTM recurrence over one chunk of timesteps (in-kernel loop).

    xproj_ref: (4, TC, B, H)  per-gate x@W_ih^T + bias for this chunk
    whh_ref:   (4, H, H)      per-gate W_hh^T (VMEM-resident)
    out_ref:   (TC, B, H)     hidden states for this chunk
    h_ref/c_ref: (B, H)       VMEM scratch state, persists across chunks
    """

    @pl.when(pl.program_id(0) == 0)
    def _():
        h_ref[...] = jnp.zeros_like(h_ref)
        c_ref[...] = jnp.zeros_like(c_ref)

    tc = out_ref.shape[0]

    def step(t, carry):
        h_prev = h_ref[...]
        c_prev = c_ref[...]
        hp = h_prev.astype(whh_ref.dtype)
        # Four independent (B,H)x(H,H) MXU matmuls (pipelined pushes); each
        # gate pre-activation is exactly (B, H): no lane-strided slicing on
        # the serialized critical path.
        i_pre = xproj_ref[0, t] + jnp.dot(hp, whh_ref[0],
                                          preferred_element_type=jnp.float32)
        f_pre = xproj_ref[1, t] + jnp.dot(hp, whh_ref[1],
                                          preferred_element_type=jnp.float32)
        g_pre = xproj_ref[2, t] + jnp.dot(hp, whh_ref[2],
                                          preferred_element_type=jnp.float32)
        o_pre = xproj_ref[3, t] + jnp.dot(hp, whh_ref[3],
                                          preferred_element_type=jnp.float32)
        i_g = jax.nn.sigmoid(i_pre)
        f_g = jax.nn.sigmoid(f_pre)
        g_g = jnp.tanh(g_pre)
        o_g = jax.nn.sigmoid(o_pre)
        c_new = f_g * c_prev + i_g * g_g
        h_new = o_g * jnp.tanh(c_new)
        c_ref[...] = c_new
        h_ref[...] = h_new
        out_ref[t] = h_new.astype(out_ref.dtype)
        return carry

    jax.lax.fori_loop(0, tc, step, 0, unroll=(tc <= 8))


def _pick_time_chunk(T, max_chunk=128):
    """Largest chunk <= max_chunk that divides T (keeps VMEM bounded, keeps
    the chunk loop exact so h/c state is never polluted by padding)."""
    if T <= max_chunk:
        return T
    for c in range(max_chunk, 0, -1):
        if T % c == 0:
            return c
    return 1


def lstm_layer_time_major(x_tbd, w_ih_t, whh_g, bias):
    """One LSTM layer, time-major. x_tbd: (T, B, D) -> (T, B, H)."""
    T, B, D = x_tbd.shape
    H = whh_g.shape[1]

    # Hoisted, embarrassingly-parallel input projection (one big MXU matmul).
    xproj = _input_projection(x_tbd.reshape(T * B, D), w_ih_t, bias)
    xproj = xproj.reshape(4, T, B, H)          # free row-major axis split

    t_chunk = _pick_time_chunk(T)
    n_chunks = T // t_chunk

    return pl.pallas_call(
        _lstm_recurrence_kernel,
        out_shape=jax.ShapeDtypeStruct((T, B, H), jnp.float32),
        grid_spec=pltpu.PrefetchScalarGridSpec(
            num_scalar_prefetch=0,
            grid=(n_chunks,),
            in_specs=[
                pl.BlockSpec((4, t_chunk, B, H), lambda c: (0, c, 0, 0)),
                pl.BlockSpec((4, H, H), lambda c: (0, 0, 0)),
            ],
            out_specs=pl.BlockSpec((t_chunk, B, H), lambda c: (c, 0, 0)),
            scratch_shapes=[
                pltpu.VMEM((B, H), jnp.float32),   # h state
                pltpu.VMEM((B, H), jnp.float32),   # c state
            ],
        ),
        compiler_params=pltpu.CompilerParams(
            dimension_semantics=("arbitrary",),    # recurrence is sequential
            vmem_limit_bytes=_VMEM_LIMIT),
    )(xproj, whh_g)


# --------------------------- fused fc1 + fc2 ----------------------------------
def _fused_fc_kernel(x_ref, w1_ref, b1_ref, w2_ref, b2_ref, o_ref):
    """fc2(fc1(x)) for one M-tile; the (bm, 256) intermediate stays on-chip."""
    h = (jnp.dot(x_ref[...].astype(w1_ref.dtype), w1_ref[...],
                 preferred_element_type=jnp.float32)
         + b1_ref[...])
    o_ref[...] = (jnp.dot(h.astype(w2_ref.dtype), w2_ref[...],
                          preferred_element_type=jnp.float32)
                  + b2_ref[...]).astype(o_ref.dtype)


def fused_fc(x_2d, w1_t, b1, w2_t, b2):
    """x_2d: (M, H); w1_t: (H, 256); w2_t: (256, OUT). Returns (M, OUT)."""
    M, H = x_2d.shape
    F1 = w1_t.shape[1]
    OUT = w2_t.shape[1]
    block_m = M if M <= 512 else 512
    return pl.pallas_call(
        _fused_fc_kernel,
        out_shape=jax.ShapeDtypeStruct((M, OUT), jnp.float32),
        grid_spec=pltpu.PrefetchScalarGridSpec(
            num_scalar_prefetch=0,
            grid=(pl.cdiv(M, block_m),),
            in_specs=[
                pl.BlockSpec((block_m, H), lambda i: (i, 0)),
                pl.BlockSpec((H, F1), lambda i: (0, 0)),
                pl.BlockSpec((1, F1), lambda i: (0, 0)),
                pl.BlockSpec((F1, OUT), lambda i: (0, 0)),
                pl.BlockSpec((1, OUT), lambda i: (0, 0)),
            ],
            out_specs=pl.BlockSpec((block_m, OUT), lambda i: (i, 0)),
        ),
        compiler_params=pltpu.CompilerParams(
            dimension_semantics=("parallel",),
            vmem_limit_bytes=_VMEM_LIMIT),
    )(x_2d, w1_t, b1, w2_t, b2)


# ------------------------------ parameters ------------------------------------
def init_params(key, input_size, hidden_size, output_size, fc_mid=256):
    """Raw parameters in PyTorch nn.LSTM / nn.Linear layout."""
    ks = jax.random.split(key, 12)
    s = 0.1
    return {
        "w_ih1": jax.random.normal(ks[0], (4 * hidden_size, input_size), jnp.float32) * s,
        "w_hh1": jax.random.normal(ks[1], (4 * hidden_size, hidden_size), jnp.float32) * s,
        "b_ih1": jax.random.normal(ks[2], (4 * hidden_size,), jnp.float32) * s,
        "b_hh1": jax.random.normal(ks[3], (4 * hidden_size,), jnp.float32) * s,
        "w_ih2": jax.random.normal(ks[4], (4 * hidden_size, hidden_size), jnp.float32) * s,
        "w_hh2": jax.random.normal(ks[5], (4 * hidden_size, hidden_size), jnp.float32) * s,
        "b_ih2": jax.random.normal(ks[6], (4 * hidden_size,), jnp.float32) * s,
        "b_hh2": jax.random.normal(ks[7], (4 * hidden_size,), jnp.float32) * s,
        "w_fc1": jax.random.normal(ks[8], (fc_mid, hidden_size), jnp.float32) * s,
        "b_fc1": jax.random.normal(ks[9], (fc_mid,), jnp.float32) * s,
        "w_fc2": jax.random.normal(ks[10], (output_size, fc_mid), jnp.float32) * s,
        "b_fc2": jax.random.normal(ks[11], (output_size,), jnp.float32) * s,
    }


def prepare_params(raw):
    """Precompute weight transposes / fused biases ONCE at load time."""
    def pack_lstm(w_ih, w_hh, b_ih, b_hh):
        four_h, H = w_hh.shape
        assert four_h == 4 * H
        w_ih_t = jnp.asarray(w_ih, jnp.float32).T.astype(MATMUL_DTYPE)       # (D, 4H)
        whh_g = jnp.transpose(
            jnp.asarray(w_hh, jnp.float32).reshape(4, H, H), (0, 2, 1)
        ).astype(MATMUL_DTYPE)                                                # (4, H, H) = per-gate W_hh^T
        bias = (jnp.asarray(b_ih, jnp.float32)
                + jnp.asarray(b_hh, jnp.float32)).reshape(1, 4 * H)
        return w_ih_t, whh_g, bias

    w_ih1_t, whh1_g, bias1 = pack_lstm(raw["w_ih1"], raw["w_hh1"],
                                       raw["b_ih1"], raw["b_hh1"])
    w_ih2_t, whh2_g, bias2 = pack_lstm(raw["w_ih2"], raw["w_hh2"],
                                       raw["b_ih2"], raw["b_hh2"])
    return {
        "w_ih1_t": w_ih1_t, "whh1_g": whh1_g, "bias1": bias1,
        "w_ih2_t": w_ih2_t, "whh2_g": whh2_g, "bias2": bias2,
        "w_fc1_t": jnp.asarray(raw["w_fc1"], jnp.float32).T.astype(MATMUL_DTYPE),
        "b_fc1": jnp.asarray(raw["b_fc1"], jnp.float32).reshape(1, -1),
        "w_fc2_t": jnp.asarray(raw["w_fc2"], jnp.float32).T.astype(MATMUL_DTYPE),
        "b_fc2": jnp.asarray(raw["b_fc2"], jnp.float32).reshape(1, -1),
    }


# ------------------------------ full model ------------------------------------
@jax.jit
def lstm_model_forward(x_btd, params):
    """x: (B, T, input_size) -> (B, T, output_size). Matches LSTMModel.forward (eval)."""
    B, T, _ = x_btd.shape
    # Single entry transpose to time-major; everything stays (T, B, .) after this.
    x_tbd = jnp.transpose(x_btd, (1, 0, 2)).astype(jnp.float32)

    h1 = lstm_layer_time_major(x_tbd, params["w_ih1_t"], params["whh1_g"], params["bias1"])
    # dropout(0.1): identity at inference
    h2 = lstm_layer_time_major(h1, params["w_ih2_t"], params["whh2_g"], params["bias2"])

    H = h2.shape[-1]
    flat = h2.reshape(T * B, H)                        # free reshape in time-major layout
    out = fused_fc(flat, params["w_fc1_t"], params["b_fc1"],
                   params["w_fc2_t"], params["b_fc2"])
    # dropout(0.1): identity at inference
    # Single exit transpose of the small (T, B, out) result back to batch-first.
    return jnp.transpose(out.reshape(T, B, -1), (1, 0, 2))


# ----------------------------- pure-JAX reference ------------------------------
def _reference_forward(x_btd, raw):
    """Pure-JAX reference mirroring the PyTorch forward (eval mode)."""
    def lstm(x_tbd, w_ih, w_hh, b_ih, b_hh):
        H = w_hh.shape[1]
        def step(carry, x_t):
            h, c = carry
            gates = x_t @ w_ih.T + h @ w_hh.T + b_ih + b_hh
            i = jax.nn.sigmoid(gates[:, 0 * H:1 * H])
            f = jax.nn.sigmoid(gates[:, 1 * H:2 * H])
            g = jnp.tanh(gates[:, 2 * H:3 * H])
            o = jax.nn.sigmoid(gates[:, 3 * H:4 * H])
            c = f * c + i * g
            h = o * jnp.tanh(c)
            return (h, c), h
        B = x_tbd.shape[1]
        init = (jnp.zeros((B, H), jnp.float32), jnp.zeros((B, H), jnp.float32))
        _, hs = jax.lax.scan(step, init, x_tbd)
        return hs

    x_tbd = jnp.transpose(x_btd, (1, 0, 2))
    h1 = lstm(x_tbd, raw["w_ih1"], raw["w_hh1"], raw["b_ih1"], raw["b_hh1"])
    h2 = lstm(h1, raw["w_ih2"], raw["w_hh2"], raw["b_ih2"], raw["b_hh2"])
    f1 = h2 @ raw["w_fc1"].T + raw["b_fc1"]
    f2 = f1 @ raw["w_fc2"].T + raw["b_fc2"]
    return jnp.transpose(f2, (1, 0, 2))


if __name__ == "__main__":
    key = jax.random.PRNGKey(0)
    k_x, k_p = jax.random.split(key)

    # Small shapes consistent with the module: (batch, seq, input_size)
    B, T, D_IN = 2, 8, 4
    HIDDEN, OUT = 32, 16

    x = jax.random.normal(k_x, (B, T, D_IN), jnp.float32)
    raw_params = init_params(k_p, D_IN, HIDDEN, OUT)
    params = prepare_params(raw_params)    # one-time weight repack, outside the forward

    y = lstm_model_forward(x, params)
    jax.block_until_ready(y)
    assert y.shape == (B, T, OUT), y.shape

    # Correctness check against a pure-JAX reference of the PyTorch semantics.
    y_ref = _reference_forward(x, raw_params)
    np.testing.assert_allclose(np.asarray(y), np.asarray(y_ref), rtol=2e-3, atol=2e-3)

    print("KERNEL_OK")
</pallas_src>

<mosaic_0001>
module attributes {stable_mosaic.version = 11 : i64} {
  func.func @_inproj_kernel(%arg0: i32, %arg1: memref<16x32xf32, #tpu.memory_space<vmem>>, %arg2: memref<32x128xf32, #tpu.memory_space<vmem>>, %arg3: memref<1x128xf32, #tpu.memory_space<vmem>>, %arg4: memref<4x16x32xf32, #tpu.memory_space<vmem>>) attributes {dimension_semantics = [#tpu.dimension_semantics<parallel>], iteration_bounds = array<i64: 1>, scalar_prefetch = 0 : i64, scratch_operands = 0 : i64, tpu.core_type = #tpu.core_type<tc>, window_params = [{transform_indices = @transform_0, window_bounds = array<i64: 16, 32>}, {pipeline_mode = #tpu.pipeline_mode<synchronous>, transform_indices = @transform_1, window_bounds = array<i64: 32, 128>}, {pipeline_mode = #tpu.pipeline_mode<synchronous>, transform_indices = @transform_2, window_bounds = array<i64: 1, 128>}, {transform_indices = @transform_3, window_bounds = array<i64: 4, 16, 32>}]} {
    %c0 = arith.constant 0 : index
    %c0_0 = arith.constant 0 : index
    %0 = vector.load %arg1[%c0, %c0_0] : memref<16x32xf32, #tpu.memory_space<vmem>>, vector<16x32xf32>
    %c0_1 = arith.constant 0 : index
    %c0_2 = arith.constant 0 : index
    %1 = vector.load %arg2[%c0_1, %c0_2] : memref<32x128xf32, #tpu.memory_space<vmem>>, vector<32x128xf32>
    %cst = arith.constant dense<0.000000e+00> : vector<16x128xf32>
    %2 = tpu.matmul %0, %1, %cst {dimension_numbers = #tpu.dot_dimension_numbers<[1], [0], [0], [1], [0, 0, 1, 1], [], []>} : vector<16x32xf32>, vector<32x128xf32>, vector<16x128xf32> -> vector<16x128xf32>
    %c0_3 = arith.constant 0 : index
    %c0_4 = arith.constant 0 : index
    %3 = vector.load %arg3[%c0_3, %c0_4] : memref<1x128xf32, #tpu.memory_space<vmem>>, vector<1x128xf32>
    %4 = vector.broadcast %3 : vector<1x128xf32> to vector<16x128xf32>
    %5 = arith.addf %2, %4 : vector<16x128xf32>
    %6 = vector.extract_strided_slice %5 {offsets = [0, 0], sizes = [16, 32], strides = [1, 1]} : vector<16x128xf32> to vector<16x32xf32>
    %c0_5 = arith.constant 0 : index
    %c0_6 = arith.constant 0 : index
    %c0_7 = arith.constant 0 : index
    %7 = vector.load %arg4[%c0_5, %c0_6, %c0_7] : memref<4x16x32xf32, #tpu.memory_space<vmem>>, vector<1x16x32xf32>
    %8 = vector.shape_cast %7 : vector<1x16x32xf32> to vector<16x32xf32>
    %9 = vector.shape_cast %6 : vector<16x32xf32> to vector<1x16x32xf32>
    tpu.vector_store %arg4[%c0_5, %c0_6, %c0_7], %9 {strides = array<i32>} : memref<4x16x32xf32, #tpu.memory_space<vmem>>, vector<1x16x32xf32>,
    %10 = vector.extract_strided_slice %5 {offsets = [0, 32], sizes = [16, 32], strides = [1, 1]} : vector<16x128xf32> to vector<16x32xf32>
    %c1 = arith.constant 1 : index
    %c0_8 = arith.constant 0 : index
    %c0_9 = arith.constant 0 : index
    %11 = vector.load %arg4[%c1, %c0_8, %c0_9] : memref<4x16x32xf32, #tpu.memory_space<vmem>>, vector<1x16x32xf32>
    %12 = vector.shape_cast %11 : vector<1x16x32xf32> to vector<16x32xf32>
    %13 = vector.shape_cast %10 : vector<16x32xf32> to vector<1x16x32xf32>
    tpu.vector_store %arg4[%c1, %c0_8, %c0_9], %13 {strides = array<i32>} : memref<4x16x32xf32, #tpu.memory_space<vmem>>, vector<1x16x32xf32>,
    %14 = vector.extract_strided_slice %5 {offsets = [0, 64], sizes = [16, 32], strides = [1, 1]} : vector<16x128xf32> to vector<16x32xf32>
    %c2 = arith.constant 2 : index
    %c0_10 = arith.constant 0 : index
    %c0_11 = arith.constant 0 : index
    %15 = vector.load %arg4[%c2, %c0_10, %c0_11] : memref<4x16x32xf32, #tpu.memory_space<vmem>>, vector<1x16x32xf32>
    %16 = vector.shape_cast %15 : vector<1x16x32xf32> to vector<16x32xf32>
    %17 = vector.shape_cast %14 : vector<16x32xf32> to vector<1x16x32xf32>
    tpu.vector_store %arg4[%c2, %c0_10, %c0_11], %17 {strides = array<i32>} : memref<4x16x32xf32, #tpu.memory_space<vmem>>, vector<1x16x32xf32>,
    %18 = vector.extract_strided_slice %5 {offsets = [0, 96], sizes = [16, 32], strides = [1, 1]} : vector<16x128xf32> to vector<16x32xf32>
    %c3 = arith.constant 3 : index
    %c0_12 = arith.constant 0 : index
    %c0_13 = arith.constant 0 : index
    %19 = vector.load %arg4[%c3, %c0_12, %c0_13] : memref<4x16x32xf32, #tpu.memory_space<vmem>>, vector<1x16x32xf32>
    %20 = vector.shape_cast %19 : vector<1x16x32xf32> to vector<16x32xf32>
    %21 = vector.shape_cast %18 : vector<16x32xf32> to vector<1x16x32xf32>
    tpu.vector_store %arg4[%c3, %c0_12, %c0_13], %21 {strides = array<i32>} : memref<4x16x32xf32, #tpu.memory_space<vmem>>, vector<1x16x32xf32>,
    return
  }
  func.func @transform_0(%arg0: i32) -> (i32, i32) {
    %c0_i32 = arith.constant 0 : i32
    %c0_i32_0 = arith.constant 0 : i32
    return %arg0, %c0_i32 : i32, i32
  }
  func.func @transform_1(%arg0: i32) -> (i32, i32) {
    %c0_i32 = arith.constant 0 : i32
    %c0_i32_0 = arith.constant 0 : i32
    %c0_i32_1 = arith.constant 0 : i32
    return %c0_i32, %c0_i32_0 : i32, i32
  }
  func.func @transform_2(%arg0: i32) -> (i32, i32) {
    %c0_i32 = arith.constant 0 : i32
    %c0_i32_0 = arith.constant 0 : i32
    %c0_i32_1 = arith.constant 0 : i32
    return %c0_i32, %c0_i32_0 : i32, i32
  }
  func.func @transform_3(%arg0: i32) -> (i32, i32, i32) {
    %c0_i32 = arith.constant 0 : i32
    %c0_i32_0 = arith.constant 0 : i32
    %c0_i32_1 = arith.constant 0 : i32
    return %c0_i32, %arg0, %c0_i32_0 : i32, i32, i32
  }
}

module attributes {stable_mosaic.version = 11 : i64} {
  func.func @_inproj_kernel(%arg0: i32, %arg1: memref<16x4xf32, #tpu.memory_space<vmem>>, %arg2: memref<4x128xf32, #tpu.memory_space<vmem>>, %arg3: memref<1x128xf32, #tpu.memory_space<vmem>>, %arg4: memref<4x16x32xf32, #tpu.memory_space<vmem>>) attributes {dimension_semantics = [#tpu.dimension_semantics<parallel>], iteration_bounds = array<i64: 1>, scalar_prefetch = 0 : i64, scratch_operands = 0 : i64, tpu.core_type = #tpu.core_type<tc>, window_params = [{transform_indices = @transform_0, window_bounds = array<i64: 16, 4>}, {pipeline_mode = #tpu.pipeline_mode<synchronous>, transform_indices = @transform_1, window_bounds = array<i64: 4, 128>}, {pipeline_mode = #tpu.pipeline_mode<synchronous>, transform_indices = @transform_2, window_bounds = array<i64: 1, 128>}, {transform_indices = @transform_3, window_bounds = array<i64: 4, 16, 32>}]} {
    %c0 = arith.constant 0 : index
    %c0_0 = arith.constant 0 : index
    %0 = vector.load %arg1[%c0, %c0_0] : memref<16x4xf32, #tpu.memory_space<vmem>>, vector<16x4xf32>
    %c0_1 = arith.constant 0 : index
    %c0_2 = arith.constant 0 : index
    %1 = vector.load %arg2[%c0_1, %c0_2] : memref<4x128xf32, #tpu.memory_space<vmem>>, vector<4x128xf32>
    %cst = arith.constant dense<0.000000e+00> : vector<16x128xf32>
    %2 = tpu.matmul %0, %1, %cst {dimension_numbers = #tpu.dot_dimension_numbers<[1], [0], [0], [1], [0, 0, 1, 1], [], []>} : vector<16x4xf32>, vector<4x128xf32>, vector<16x128xf32> -> vector<16x128xf32>
    %c0_3 = arith.constant 0 : index
    %c0_4 = arith.constant 0 : index
    %3 = vector.load %arg3[%c0_3, %c0_4] : memref<1x128xf32, #tpu.memory_space<vmem>>, vector<1x128xf32>
    %4 = vector.broadcast %3 : vector<1x128xf32> to vector<16x128xf32>
    %5 = arith.addf %2, %4 : vector<16x128xf32>
    %6 = vector.extract_strided_slice %5 {offsets = [0, 0], sizes = [16, 32], strides = [1, 1]} : vector<16x128xf32> to vector<16x32xf32>
    %c0_5 = arith.constant 0 : index
    %c0_6 = arith.constant 0 : index
    %c0_7 = arith.constant 0 : index
    %7 = vector.load %arg4[%c0_5, %c0_6, %c0_7] : memref<4x16x32xf32, #tpu.memory_space<vmem>>, vector<1x16x32xf32>
    %8 = vector.shape_cast %7 : vector<1x16x32xf32> to vector<16x32xf32>
    %9 = vector.shape_cast %6 : vector<16x32xf32> to vector<1x16x32xf32>
    tpu.vector_store %arg4[%c0_5, %c0_6, %c0_7], %9 {strides = array<i32>} : memref<4x16x32xf32, #tpu.memory_space<vmem>>, vector<1x16x32xf32>,
    %10 = vector.extract_strided_slice %5 {offsets = [0, 32], sizes = [16, 32], strides = [1, 1]} : vector<16x128xf32> to vector<16x32xf32>
    %c1 = arith.constant 1 : index
    %c0_8 = arith.constant 0 : index
    %c0_9 = arith.constant 0 : index
    %11 = vector.load %arg4[%c1, %c0_8, %c0_9] : memref<4x16x32xf32, #tpu.memory_space<vmem>>, vector<1x16x32xf32>
    %12 = vector.shape_cast %11 : vector<1x16x32xf32> to vector<16x32xf32>
    %13 = vector.shape_cast %10 : vector<16x32xf32> to vector<1x16x32xf32>
    tpu.vector_store %arg4[%c1, %c0_8, %c0_9], %13 {strides = array<i32>} : memref<4x16x32xf32, #tpu.memory_space<vmem>>, vector<1x16x32xf32>,
    %14 = vector.extract_strided_slice %5 {offsets = [0, 64], sizes = [16, 32], strides = [1, 1]} : vector<16x128xf32> to vector<16x32xf32>
    %c2 = arith.constant 2 : index
    %c0_10 = arith.constant 0 : index
    %c0_11 = arith.constant 0 : index
    %15 = vector.load %arg4[%c2, %c0_10, %c0_11] : memref<4x16x32xf32, #tpu.memory_space<vmem>>, vector<1x16x32xf32>
    %16 = vector.shape_cast %15 : vector<1x16x32xf32> to vector<16x32xf32>
    %17 = vector.shape_cast %14 : vector<16x32xf32> to vector<1x16x32xf32>
    tpu.vector_store %arg4[%c2, %c0_10, %c0_11], %17 {strides = array<i32>} : memref<4x16x32xf32, #tpu.memory_space<vmem>>, vector<1x16x32xf32>,
    %18 = vector.extract_strided_slice %5 {offsets = [0, 96], sizes = [16, 32], strides = [1, 1]} : vector<16x128xf32> to vector<16x32xf32>
    %c3 = arith.constant 3 : index
    %c0_12 = arith.constant 0 : index
    %c0_13 = arith.constant 0 : index
    %19 = vector.load %arg4[%c3, %c0_12, %c0_13] : memref<4x16x32xf32, #tpu.memory_space<vmem>>, vector<1x16x32xf32>
    %20 = vector.shape_cast %19 : vector<1x16x32xf32> to vector<16x32xf32>
    %21 = vector.shape_cast %18 : vector<16x32xf32> to vector<1x16x32xf32>
    tpu.vector_store %arg4[%c3, %c0_12, %c0_13], %21 {strides = array<i32>} : memref<4x16x32xf32, #tpu.memory_space<vmem>>, vector<1x16x32xf32>,
    return
  }
  func.func @transform_0(%arg0: i32) -> (i32, i32) {
    %c0_i32 = arith.constant 0 : i32
    %c0_i32_0 = arith.constant 0 : i32
    return %arg0, %c0_i32 : i32, i32
  }
  func.func @transform_1(%arg0: i32) -> (i32, i32) {
    %c0_i32 = arith.constant 0 : i32
    %c0_i32_0 = arith.constant 0 : i32
    %c0_i32_1 = arith.constant 0 : i32
    return %c0_i32, %c0_i32_0 : i32, i32
  }
  func.func @transform_2(%arg0: i32) -> (i32, i32) {
    %c0_i32 = arith.constant 0 : i32
    %c0_i32_0 = arith.constant 0 : i32
    %c0_i32_1 = arith.constant 0 : i32
    return %c0_i32, %c0_i32_0 : i32, i32
  }
  func.func @transform_3(%arg0: i32) -> (i32, i32, i32) {
    %c0_i32 = arith.constant 0 : i32
    %c0_i32_0 = arith.constant 0 : i32
    %c0_i32_1 = arith.constant 0 : i32
    return %c0_i32, %arg0, %c0_i32_0 : i32, i32, i32
  }
}

module attributes {stable_mosaic.version = 11 : i64} {
  func.func @_lstm_recurrence_kernel(%arg0: i32, %arg1: memref<4x8x2x32xf32, #tpu.memory_space<vmem>>, %arg2: memref<4x32x32xf32, #tpu.memory_space<vmem>>, %arg3: memref<8x2x32xf32, #tpu.memory_space<vmem>>, %arg4: memref<2x32xf32, #tpu.memory_space<vmem>>, %arg5: memref<2x32xf32, #tpu.memory_space<vmem>>) attributes {dimension_semantics = [#tpu.dimension_semantics<arbitrary>], iteration_bounds = array<i64: 1>, scalar_prefetch = 0 : i64, scratch_operands = 2 : i64, tpu.core_type = #tpu.core_type<tc>, window_params = [{transform_indices = @transform_0, window_bounds = array<i64: 4, 8, 2, 32>}, {pipeline_mode = #tpu.pipeline_mode<synchronous>, transform_indices = @transform_1, window_bounds = array<i64: 4, 32, 32>}, {transform_indices = @transform_2, window_bounds = array<i64: 8, 2, 32>}]} {
    %c0_i32 = arith.constant 0 : i32
    %0 = arith.cmpi eq, %arg0, %c0_i32 : i32
    %1 = arith.extui %0 : i1 to i32
    %c0_i32_0 = arith.constant 0 : i32
    %2 = arith.cmpi ne, %1, %c0_i32_0 : i32
    scf.if %2 {
      %cst_325 = arith.constant 0.000000e+00 : f32
      %459 = vector.broadcast %cst_325 : f32 to vector<2x32xf32>
      %c0_326 = arith.constant 0 : index
      %c0_327 = arith.constant 0 : index
      %460 = vector.load %arg4[%c0_326, %c0_327] : memref<2x32xf32, #tpu.memory_space<vmem>>, vector<2x32xf32>
      tpu.vector_store %arg4[%c0_326, %c0_327], %459 {strides = array<i32>} : memref<2x32xf32, #tpu.memory_space<vmem>>, vector<2x32xf32>,
      %cst_328 = arith.constant 0.000000e+00 : f32
      %461 = vector.broadcast %cst_328 : f32 to vector<2x32xf32>
      %c0_329 = arith.constant 0 : index
      %c0_330 = arith.constant 0 : index
      %462 = vector.load %arg5[%c0_329, %c0_330] : memref<2x32xf32, #tpu.memory_space<vmem>>, vector<2x32xf32>
      tpu.vector_store %arg5[%c0_329, %c0_330], %461 {strides = array<i32>} : memref<2x32xf32, #tpu.memory_space<vmem>>, vector<2x32xf32>,
    } else {
    }
    %c0_i32_1 = arith.constant 0 : i32
    %c0 = arith.constant 0 : index
    %c0_2 = arith.constant 0 : index
    %3 = vector.load %arg4[%c0, %c0_2] : memref<2x32xf32, #tpu.memory_space<vmem>>, vector<2x32xf32>
    %c0_3 = arith.constant 0 : index
    %c0_4 = arith.constant 0 : index
    %4 = vector.load %arg5[%c0_3, %c0_4] : memref<2x32xf32, #tpu.memory_space<vmem>>, vector<2x32xf32>
    %c0_5 = arith.constant 0 : index
    %5 = arith.index_cast %c0_i32_1 : i32 to index
    %c0_6 = arith.constant 0 : index
    %c0_7 = arith.constant 0 : index
    %6 = vector.load %arg1[%c0_5, %5, %c0_6, %c0_7] : memref<4x8x2x32xf32, #tpu.memory_space<vmem>>, vector<1x1x2x32xf32>
    %7 = vector.shape_cast %6 : vector<1x1x2x32xf32> to vector<2x32xf32>
    %c0_8 = arith.constant 0 : index
    %c0_9 = arith.constant 0 : index
    %c0_10 = arith.constant 0 : index
    %8 = vector.load %arg2[%c0_8, %c0_9, %c0_10] : memref<4x32x32xf32, #tpu.memory_space<vmem>>, vector<1x32x32xf32>
    %9 = vector.shape_cast %8 : vector<1x32x32xf32> to vector<32x32xf32>
    %cst = arith.constant dense<0.000000e+00> : vector<2x32xf32>
    %10 = tpu.matmul %3, %9, %cst {dimension_numbers = #tpu.dot_dimension_numbers<[1], [0], [0], [1], [0, 0, 1, 1], [], []>} : vector<2x32xf32>, vector<32x32xf32>, vector<2x32xf32> -> vector<2x32xf32>
    %11 = arith.addf %7, %10 : vector<2x32xf32>
    %c1 = arith.constant 1 : index
    %12 = arith.index_cast %c0_i32_1 : i32 to index
    %c0_11 = arith.constant 0 : index
    %c0_12 = arith.constant 0 : index
    %13 = vector.load %arg1[%c1, %12, %c0_11, %c0_12] : memref<4x8x2x32xf32, #tpu.memory_space<vmem>>, vector<1x1x2x32xf32>
    %14 = vector.shape_cast %13 : vector<1x1x2x32xf32> to vector<2x32xf32>
    %c1_13 = arith.constant 1 : index
    %c0_14 = arith.constant 0 : index
    %c0_15 = arith.constant 0 : index
    %15 = vector.load %arg2[%c1_13, %c0_14, %c0_15] : memref<4x32x32xf32, #tpu.memory_space<vmem>>, vector<1x32x32xf32>
    %16 = vector.shape_cast %15 : vector<1x32x32xf32> to vector<32x32xf32>
    %cst_16 = arith.constant dense<0.000000e+00> : vector<2x32xf32>
    %17 = tpu.matmul %3, %16, %cst_16 {dimension_numbers = #tpu.dot_dimension_numbers<[1], [0], [0], [1], [0, 0, 1, 1], [], []>} : vector<2x32xf32>, vector<32x32xf32>, vector<2x32xf32> -> vector<2x32xf32>
    %18 = arith.addf %14, %17 : vector<2x32xf32>
    %c2 = arith.constant 2 : index
    %19 = arith.index_cast %c0_i32_1 : i32 to index
    %c0_17 = arith.constant 0 : index
    %c0_18 = arith.constant 0 : index
    %20 = vector.load %arg1[%c2, %19, %c0_17, %c0_18] : memref<4x8x2x32xf32, #tpu.memory_space<vmem>>, vector<1x1x2x32xf32>
    %21 = vector.shape_cast %20 : vector<1x1x2x32xf32> to vector<2x32xf32>
    %c2_19 = arith.constant 2 : index
    %c0_20 = arith.constant 0 : index
    %c0_21 = arith.constant 0 : index
    %22 = vector.load %arg2[%c2_19, %c0_20, %c0_21] : memref<4x32x32xf32, #tpu.memory_space<vmem>>, vector<1x32x32xf32>
    %23 = vector.shape_cast %22 : vector<1x32x32xf32> to vector<32x32xf32>
    %cst_22 = arith.constant dense<0.000000e+00> : vector<2x32xf32>
    %24 = tpu.matmul %3, %23, %cst_22 {dimension_numbers = #tpu.dot_dimension_numbers<[1], [0], [0], [1], [0, 0, 1, 1], [], []>} : vector<2x32xf32>, vector<32x32xf32>, vector<2x32xf32> -> vector<2x32xf32>
    %25 = arith.addf %21, %24 : vector<2x32xf32>
    %c3 = arith.constant 3 : index
    %26 = arith.index_cast %c0_i32_1 : i32 to index
    %c0_23 = arith.constant 0 : index
    %c0_24 = arith.constant 0 : index
    %27 = vector.load %arg1[%c3, %26, %c0_23, %c0_24] : memref<4x8x2x32xf32, #tpu.memory_space<vmem>>, vector<1x1x2x32xf32>
    %28 = vector.shape_cast %27 : vector<1x1x2x32xf32> to vector<2x32xf32>
    %c3_25 = arith.constant 3 : index
    %c0_26 = arith.constant 0 : index
    %c0_27 = arith.constant 0 : index
    %29 = vector.load %arg2[%c3_25, %c0_26, %c0_27] : memref<4x32x32xf32, #tpu.memory_space<vmem>>, vector<1x32x32xf32>
    %30 = vector.shape_cast %29 : vector<1x32x32xf32> to vector<32x32xf32>
    %cst_28 = arith.constant dense<0.000000e+00> : vector<2x32xf32>
    %31 = tpu.matmul %3, %30, %cst_28 {dimension_numbers = #tpu.dot_dimension_numbers<[1], [0], [0], [1], [0, 0, 1, 1], [], []>} : vector<2x32xf32>, vector<32x32xf32>, vector<2x32xf32> -> vector<2x32xf32>
    %32 = arith.addf %28, %31 : vector<2x32xf32>
    %33 = arith.negf %11 : vector<2x32xf32>
    %34 = math.exp %33 : vector<2x32xf32>
    %cst_29 = arith.constant 1.000000e+00 : f32
    %35 = vector.broadcast %cst_29 : f32 to vector<2x32xf32>
    %36 = arith.addf %35, %34 : vector<2x32xf32>
    %37 = arith.divf %35, %36 : vector<2x32xf32>
    %38 = arith.negf %18 : vector<2x32xf32>
    %39 = math.exp %38 : vector<2x32xf32>
    %cst_30 = arith.constant 1.000000e+00 : f32
    %40 = vector.broadcast %cst_30 : f32 to vector<2x32xf32>
    %41 = arith.addf %40, %39 : vector<2x32xf32>
    %42 = arith.divf %40, %41 : vector<2x32xf32>
    %43 = math.tanh %25 : vector<2x32xf32>
    %44 = arith.negf %32 : vector<2x32xf32>
    %45 = math.exp %44 : vector<2x32xf32>
    %cst_31 = arith.constant 1.000000e+00 : f32
    %46 = vector.broadcast %cst_31 : f32 to vector<2x32xf32>
    %47 = arith.addf %46, %45 : vector<2x32xf32>
    %48 = arith.divf %46, %47 : vector<2x32xf32>
    %49 = arith.mulf %42, %4 : vector<2x32xf32>
    %50 = arith.mulf %37, %43 : vector<2x32xf32>
    %51 = arith.addf %49, %50 : vector<2x32xf32>
    %52 = math.tanh %51 : vector<2x32xf32>
    %53 = arith.mulf %48, %52 : vector<2x32xf32>
    %c0_32 = arith.constant 0 : index
    %c0_33 = arith.constant 0 : index
    %54 = vector.load %arg5[%c0_32, %c0_33] : memref<2x32xf32, #tpu.memory_space<vmem>>, vector<2x32xf32>
    tpu.vector_store %arg5[%c0_32, %c0_33], %51 {strides = array<i32>} : memref<2x32xf32, #tpu.memory_space<vmem>>, vector<2x32xf32>,
    %c0_34 = arith.constant 0 : index
    %c0_35 = arith.constant 0 : index
    %55 = vector.load %arg4[%c0_34, %c0_35] : memref<2x32xf32, #tpu.memory_space<vmem>>, vector<2x32xf32>
    tpu.vector_store %arg4[%c0_34, %c0_35], %53 {strides = array<i32>} : memref<2x32xf32, #tpu.memory_space<vmem>>, vector<2x32xf32>,
    %56 = arith.index_cast %c0_i32_1 : i32 to index
    %c0_36 = arith.constant 0 : index
    %c0_37 = arith.constant 0 : index
    %57 = vector.load %arg3[%56, %c0_36, %c0_37] : memref<8x2x32xf32, #tpu.memory_space<vmem>>, vector<1x2x32xf32>
    %58 = vector.shape_cast %57 : vector<1x2x32xf32> to vector<2x32xf32>
    %59 = vector.shape_cast %53 : vector<2x32xf32> to vector<1x2x32xf32>
    tpu.vector_store %arg3[%56, %c0_36, %c0_37], %59 {strides = array<i32>} : memref<8x2x32xf32, #tpu.memory_space<vmem>>, vector<1x2x32xf32>,
    %c1_i32 = arith.constant 1 : i32
    %c0_38 = arith.constant 0 : index
    %c0_39 = arith.constant 0 : index
    %60 = vector.load %arg4[%c0_38, %c0_39] : memref<2x32xf32, #tpu.memory_space<vmem>>, vector<2x32xf32>
    %c0_40 = arith.constant 0 : index
    %c0_41 = arith.constant 0 : index
    %61 = vector.load %arg5[%c0_40, %c0_41] : memref<2x32xf32, #tpu.memory_space<vmem>>, vector<2x32xf32>
    %c0_42 = arith.constant 0 : index
    %62 = arith.index_cast %c1_i32 : i32 to index
    %c0_43 = arith.constant 0 : index
    %c0_44 = arith.constant 0 : index
    %63 = vector.load %arg1[%c0_42, %62, %c0_43, %c0_44] : memref<4x8x2x32xf32, #tpu.memory_space<vmem>>, vector<1x1x2x32xf32>
    %64 = vector.shape_cast %63 : vector<1x1x2x32xf32> to vector<2x32xf32>
    %c0_45 = arith.constant 0 : index
    %c0_46 = arith.constant 0 : index
    %c0_47 = arith.constant 0 : index
    %65 = vector.load %arg2[%c0_45, %c0_46, %c0_47] : memref<4x32x32xf32, #tpu.memory_space<vmem>>, vector<1x32x32xf32>
    %66 = vector.shape_cast %65 : vector<1x32x32xf32> to vector<32x32xf32>
    %cst_48 = arith.constant dense<0.000000e+00> : vector<2x32xf32>
    %67 = tpu.matmul %60, %66, %cst_48 {dimension_numbers = #tpu.dot_dimension_numbers<[1], [0], [0], [1], [0, 0, 1, 1], [], []>} : vector<2x32xf32>, vector<32x32xf32>, vector<2x32xf32> -> vector<2x32xf32>
    %68 = arith.addf %64, %67 : vector<2x32xf32>
    %c1_49 = arith.constant 1 : index
    %69 = arith.index_cast %c1_i32 : i32 to index
    %c0_50 = arith.constant 0 : index
    %c0_51 = arith.constant 0 : index
    %70 = vector.load %arg1[%c1_49, %69, %c0_50, %c0_51] : memref<4x8x2x32xf32, #tpu.memory_space<vmem>>, vector<1x1x2x32xf32>
    %71 = vector.shape_cast %70 : vector<1x1x2x32xf32> to vector<2x32xf32>
    %c1_52 = arith.constant 1 : index
    %c0_53 = arith.constant 0 : index
    %c0_54 = arith.constant 0 : index
    %72 = vector.load %arg2[%c1_52, %c0_53, %c0_54] : memref<4x32x32xf32, #tpu.memory_space<vmem>>, vector<1x32x32xf32>
    %73 = vector.shape_cast %72 : vector<1x32x32xf32> to vector<32x32xf32>
    %cst_55 = arith.constant dense<0.000000e+00> : vector<2x32xf32>
    %74 = tpu.matmul %60, %73, %cst_55 {dimension_numbers = #tpu.dot_dimension_numbers<[1], [0], [0], [1], [0, 0, 1, 1], [], []>} : vector<2x32xf32>, vector<32x32xf32>, vector<2x32xf32> -> vector<2x32xf32>
    %75 = arith.addf %71, %74 : vector<2x32xf32>
    %c2_56 = arith.constant 2 : index
    %76 = arith.index_cast %c1_i32 : i32 to index
    %c0_57 = arith.constant 0 : index
    %c0_58 = arith.constant 0 : index
    %77 = vector.load %arg1[%c2_56, %76, %c0_57, %c0_58] : memref<4x8x2x32xf32, #tpu.memory_space<vmem>>, vector<1x1x2x32xf32>
    %78 = vector.shape_cast %77 : vector<1x1x2x32xf32> to vector<2x32xf32>
    %c2_59 = arith.constant 2 : index
    %c0_60 = arith.constant 0 : index
    %c0_61 = arith.constant 0 : index
    %79 = vector.load %arg2[%c2_59, %c0_60, %c0_61] : memref<4x32x32xf32, #tpu.memory_space<vmem>>, vector<1x32x32xf32>
    %80 = vector.shape_cast %79 : vector<1x32x32xf32> to vector<32x32xf32>
    %cst_62 = arith.constant dense<0.000000e+00> : vector<2x32xf32>
    %81 = tpu.matmul %60, %80, %cst_62 {dimension_numbers = #tpu.dot_dimension_numbers<[1], [0], [0], [1], [0, 0, 1, 1], [], []>} : vector<2x32xf32>, vector<32x32xf32>, vector<2x32xf32> -> vector<2x32xf32>
    %82 = arith.addf %78, %81 : vector<2x32xf32>
    %c3_63 = arith.constant 3 : index
    %83 = arith.index_cast %c1_i32 : i32 to index
    %c0_64 = arith.constant 0 : index
    %c0_65 = arith.constant 0 : index
    %84 = vector.load %arg1[%c3_63, %83, %c0_64, %c0_65] : memref<4x8x2x32xf32, #tpu.memory_space<vmem>>, vector<1x1x2x32xf32>
    %85 = vector.shape_cast %84 : vector<1x1x2x32xf32> to vector<2x32xf32>
    %c3_66 = arith.constant 3 : index
    %c0_67 = arith.constant 0 : index
    %c0_68 = arith.constant 0 : index
    %86 = vector.load %arg2[%c3_66, %c0_67, %c0_68] : memref<4x32x32xf32, #tpu.memory_space<vmem>>, vector<1x32x32xf32>
    %87 = vector.shape_cast %86 : vector<1x32x32xf32> to vector<32x32xf32>
    %cst_69 = arith.constant dense<0.000000e+00> : vector<2x32xf32>
    %88 = tpu.matmul %60, %87, %cst_69 {dimension_numbers = #tpu.dot_dimension_numbers<[1], [0], [0], [1], [0, 0, 1, 1], [], []>} : vector<2x32xf32>, vector<32x32xf32>, vector<2x32xf32> -> vector<2x32xf32>
    %89 = arith.addf %85, %88 : vector<2x32xf32>
    %90 = arith.negf %68 : vector<2x32xf32>
    %91 = math.exp %90 : vector<2x32xf32>
    %cst_70 = arith.constant 1.000000e+00 : f32
    %92 = vector.broadcast %cst_70 : f32 to vector<2x32xf32>
    %93 = arith.addf %92, %91 : vector<2x32xf32>
    %94 = arith.divf %92, %93 : vector<2x32xf32>
    %95 = arith.negf %75 : vector<2x32xf32>
    %96 = math.exp %95 : vector<2x32xf32>
    %cst_71 = arith.constant 1.000000e+00 : f32
    %97 = vector.broadcast %cst_71 : f32 to vector<2x32xf32>
    %98 = arith.addf %97, %96 : vector<2x32xf32>
    %99 = arith.divf %97, %98 : vector<2x32xf32>
    %100 = math.tanh %82 : vector<2x32xf32>
    %101 = arith.negf %89 : vector<2x32xf32>
    %102 = math.exp %101 : vector<2x32xf32>
    %cst_72 = arith.constant 1.000000e+00 : f32
    %103 = vector.broadcast %cst_72 : f32 to vector<2x32xf32>
    %104 = arith.addf %103, %102 : vector<2x32xf32>
    %105 = arith.divf %103, %104 : vector<2x32xf32>
    %106 = arith.mulf %99, %61 : vector<2x32xf32>
    %107 = arith.mulf %94, %100 : vector<2x32xf32>
    %108 = arith.addf %106, %107 : vector<2x32xf32>
    %109 = math.tanh %108 : vector<2x32xf32>
    %110 = arith.mulf %105, %109 : vector<2x32xf32>
    %c0_73 = arith.constant 0 : index
    %c0_74 = arith.constant 0 : index
    %111 = vector.load %arg5[%c0_73, %c0_74] : memref<2x32xf32, #tpu.memory_space<vmem>>, vector<2x32xf32>
    tpu.vector_store %arg5[%c0_73, %c0_74], %108 {strides = array<i32>} : memref<2x32xf32, #tpu.memory_space<vmem>>, vector<2x32xf32>,
    %c0_75 = arith.constant 0 : index
    %c0_76 = arith.constant 0 : index
    %112 = vector.load %arg4[%c0_75, %c0_76] : memref<2x32xf32, #tpu.memory_space<vmem>>, vector<2x32xf32>
    tpu.vector_store %arg4[%c0_75, %c0_76], %110 {strides = array<i32>} : memref<2x32xf32, #tpu.memory_space<vmem>>, vector<2x32xf32>,
    %113 = arith.index_cast %c1_i32 : i32 to index
    %c0_77 = arith.constant 0 : index
    %c0_78 = arith.constant 0 : index
    %114 = vector.load %arg3[%113, %c0_77, %c0_78] : memref<8x2x32xf32, #tpu.memory_space<vmem>>, vector<1x2x32xf32>
    %115 = vector.shape_cast %114 : vector<1x2x32xf32> to vector<2x32xf32>
    %116 = vector.shape_cast %110 : vector<2x32xf32> to vector<1x2x32xf32>
    tpu.vector_store %arg3[%113, %c0_77, %c0_78], %116 {strides = array<i32>} : memref<8x2x32xf32, #tpu.memory_space<vmem>>, vector<1x2x32xf32>,
    %c2_i32 = arith.constant 2 : i32
    %c0_79 = arith.constant 0 : index
    %c0_80 = arith.constant 0 : index
    %117 = vector.load %arg4[%c0_79, %c0_80] : memref<2x32xf32, #tpu.memory_space<vmem>>, vector<2x32xf32>
    %c0_81 = arith.constant 0 : index
    %c0_82 = arith.constant 0 : index
    %118 = vector.load %arg5[%c0_81, %c0_82] : memref<2x32xf32, #tpu.memory_space<vmem>>, vector<2x32xf32>
    %c0_83 = arith.constant 0 : index
    %119 = arith.index_cast %c2_i32 : i32 to index
    %c0_84 = arith.constant 0 : index
    %c0_85 = arith.constant 0 : index
    %120 = vector.load %arg1[%c0_83, %119, %c0_84, %c0_85] : memref<4x8x2x32xf32, #tpu.memory_space<vmem>>, vector<1x1x2x32xf32>
    %121 = vector.shape_cast %120 : vector<1x1x2x32xf32> to vector<2x32xf32>
    %c0_86 = arith.constant 0 : index
    %c0_87 = arith.constant 0 : index
    %c0_88 = arith.constant 0 : index
    %122 = vector.load %arg2[%c0_86, %c0_87, %c0_88] : memref<4x32x32xf32, #tpu.memory_space<vmem>>, vector<1x32x32xf32>
    %123 = vector.shape_cast %122 : vector<1x32x32xf32> to vector<32x32xf32>
    %cst_89 = arith.constant dense<0.000000e+00> : vector<2x32xf32>
    %124 = tpu.matmul %117, %123, %cst_89 {dimension_numbers = #tpu.dot_dimension_numbers<[1], [0], [0], [1], [0, 0, 1, 1], [], []>} : vector<2x32xf32>, vector<32x32xf32>, vector<2x32xf32> -> vector<2x32xf32>
    %125 = arith.addf %121, %124 : vector<2x32xf32>
    %c1_90 = arith.constant 1 : index
    %126 = arith.index_cast %c2_i32 : i32 to index
    %c0_91 = arith.constant 0 : index
    %c0_92 = arith.constant 0 : index
    %127 = vector.load %arg1[%c1_90, %126, %c0_91, %c0_92] : memref<4x8x2x32xf32, #tpu.memory_space<vmem>>, vector<1x1x2x32xf32>
    %128 = vector.shape_cast %127 : vector<1x1x2x32xf32> to vector<2x32xf32>
    %c1_93 = arith.constant 1 : index
    %c0_94 = arith.constant 0 : index
    %c0_95 = arith.constant 0 : index
    %129 = vector.load %arg2[%c1_93, %c0_94, %c0_95] : memref<4x32x32xf32, #tpu.memory_space<vmem>>, vector<1x32x32xf32>
    %130 = vector.shape_cast %129 : vector<1x32x32xf32> to vector<32x32xf32>
    %cst_96 = arith.constant dense<0.000000e+00> : vector<2x32xf32>
    %131 = tpu.matmul %117, %130, %cst_96 {dimension_numbers = #tpu.dot_dimension_numbers<[1], [0], [0], [1], [0, 0, 1, 1], [], []>} : vector<2x32xf32>, vector<32x32xf32>, vector<2x32xf32> -> vector<2x32xf32>
    %132 = arith.addf %128, %131 : vector<2x32xf32>
    %c2_97 = arith.constant 2 : index
    %133 = arith.index_cast %c2_i32 : i32 to index
    %c0_98 = arith.constant 0 : index
    %c0_99 = arith.constant 0 : index
    %134 = vector.load %arg1[%c2_97, %133, %c0_98, %c0_99] : memref<4x8x2x32xf32, #tpu.memory_space<vmem>>, vector<1x1x2x32xf32>
    %135 = vector.shape_cast %134 : vector<1x1x2x32xf32> to vector<2x32xf32>
    %c2_100 = arith.constant 2 : index
    %c0_101 = arith.constant 0 : index
    %c0_102 = arith.constant 0 : index
    %136 = vector.load %arg2[%c2_100, %c0_101, %c0_102] : memref<4x32x32xf32, #tpu.memory_space<vmem>>, vector<1x32x32xf32>
    %137 = vector.shape_cast %136 : vector<1x32x32xf32> to vector<32x32xf32>
    %cst_103 = arith.constant dense<0.000000e+00> : vector<2x32xf32>
    %138 = tpu.matmul %117, %137, %cst_103 {dimension_numbers = #tpu.dot_dimension_numbers<[1], [0], [0], [1], [0, 0, 1, 1], [], []>} : vector<2x32xf32>, vector<32x32xf32>, vector<2x32xf32> -> vector<2x32xf32>
    %139 = arith.addf %135, %138 : vector<2x32xf32>
    %c3_104 = arith.constant 3 : index
    %140 = arith.index_cast %c2_i32 : i32 to index
    %c0_105 = arith.constant 0 : index
    %c0_106 = arith.constant 0 : index
    %141 = vector.load %arg1[%c3_104, %140, %c0_105, %c0_106] : memref<4x8x2x32xf32, #tpu.memory_space<vmem>>, vector<1x1x2x32xf32>
    %142 = vector.shape_cast %141 : vector<1x1x2x32xf32> to vector<2x32xf32>
    %c3_107 = arith.constant 3 : index
    %c0_108 = arith.constant 0 : index
    %c0_109 = arith.constant 0 : index
    %143 = vector.load %arg2[%c3_107, %c0_108, %c0_109] : memref<4x32x32xf32, #tpu.memory_space<vmem>>, vector<1x32x32xf32>
    %144 = vector.shape_cast %143 : vector<1x32x32xf32> to vector<32x32xf32>
    %cst_110 = arith.constant dense<0.000000e+00> : vector<2x32xf32>
    %145 = tpu.matmul %117, %144, %cst_110 {dimension_numbers = #tpu.dot_dimension_numbers<[1], [0], [0], [1], [0, 0, 1, 1], [], []>} : vector<2x32xf32>, vector<32x32xf32>, vector<2x32xf32> -> vector<2x32xf32>
    %146 = arith.addf %142, %145 : vector<2x32xf32>
    %147 = arith.negf %125 : vector<2x32xf32>
    %148 = math.exp %147 : vector<2x32xf32>
    %cst_111 = arith.constant 1.000000e+00 : f32
    %149 = vector.broadcast %cst_111 : f32 to vector<2x32xf32>
    %150 = arith.addf %149, %148 : vector<2x32xf32>
    %151 = arith.divf %149, %150 : vector<2x32xf32>
    %152 = arith.negf %132 : vector<2x32xf32>
    %153 = math.exp %152 : vector<2x32xf32>
    %cst_112 = arith.constant 1.000000e+00 : f32
    %154 = vector.broadcast %cst_112 : f32 to vector<2x32xf32>
    %155 = arith.addf %154, %153 : vector<2x32xf32>
    %156 = arith.divf %154, %155 : vector<2x32xf32>
    %157 = math.tanh %139 : vector<2x32xf32>
    %158 = arith.negf %146 : vector<2x32xf32>
    %159 = math.exp %158 : vector<2x32xf32>
    %cst_113 = arith.constant 1.000000e+00 : f32
    %160 = vector.broadcast %cst_113 : f32 to vector<2x32xf32>
    %161 = arith.addf %160, %159 : vector<2x32xf32>
    %162 = arith.divf %160, %161 : vector<2x32xf32>
    %163 = arith.mulf %156, %118 : vector<2x32xf32>
    %164 = arith.mulf %151, %157 : vector<2x32xf32>
    %165 = arith.addf %163, %164 : vector<2x32xf32>
    %166 = math.tanh %165 : vector<2x32xf32>
    %167 = arith.mulf %162, %166 : vector<2x32xf32>
    %c0_114 = arith.constant 0 : index
    %c0_115 = arith.constant 0 : index
    %168 = vector.load %arg5[%c0_114, %c0_115] : memref<2x32xf32, #tpu.memory_space<vmem>>, vector<2x32xf32>
    tpu.vector_store %arg5[%c0_114, %c0_115], %165 {strides = array<i32>} : memref<2x32xf32, #tpu.memory_space<vmem>>, vector<2x32xf32>,
    %c0_116 = arith.constant 0 : index
    %c0_117 = arith.constant 0 : index
    %169 = vector.load %arg4[%c0_116, %c0_117] : memref<2x32xf32, #tpu.memory_space<vmem>>, vector<2x32xf32>
    tpu.vector_store %arg4[%c0_116, %c0_117], %167 {strides = array<i32>} : memref<2x32xf32, #tpu.memory_space<vmem>>, vector<2x32xf32>,
    %170 = arith.index_cast %c2_i32 : i32 to index
    %c0_118 = arith.constant 0 : index
    %c0_119 = arith.constant 0 : index
    %171 = vector.load %arg3[%170, %c0_118, %c0_119] : memref<8x2x32xf32, #tpu.memory_space<vmem>>, vector<1x2x32xf32>
    %172 = vector.shape_cast %171 : vector<1x2x32xf32> to vector<2x32xf32>
    %173 = vector.shape_cast %167 : vector<2x32xf32> to vector<1x2x32xf32>
    tpu.vector_store %arg3[%170, %c0_118, %c0_119], %173 {strides = array<i32>} : memref<8x2x32xf32, #tpu.memory_space<vmem>>, vector<1x2x32xf32>,
    %c3_i32 = arith.constant 3 : i32
    %c0_120 = arith.constant 0 : index
    %c0_121 = arith.constant 0 : index
    %174 = vector.load %arg4[%c0_120, %c0_121] : memref<2x32xf32, #tpu.memory_space<vmem>>, vector<2x32xf32>
    %c0_122 = arith.constant 0 : index
    %c0_123 = arith.constant 0 : index
    %175 = vector.load %arg5[%c0_122, %c0_123] : memref<2x32xf32, #tpu.memory_space<vmem>>, vector<2x32xf32>
    %c0_124 = arith.constant 0 : index
    %176 = arith.index_cast %c3_i32 : i32 to index
    %c0_125 = arith.constant 0 : index
    %c0_126 = arith.constant 0 : index
    %177 = vector.load %arg1[%c0_124, %176, %c0_125, %c0_126] : memref<4x8x2x32xf32, #tpu.memory_space<vmem>>, vector<1x1x2x32xf32>
    %178 = vector.shape_cast %177 : vector<1x1x2x32xf32> to vector<2x32xf32>
    %c0_127 = arith.constant 0 : index
    %c0_128 = arith.constant 0 : index
    %c0_129 = arith.constant 0 : index
    %179 = vector.load %arg2[%c0_127, %c0_128, %c0_129] : memref<4x32x32xf32, #tpu.memory_space<vmem>>, vector<1x32x32xf32>
    %180 = vector.shape_cast %179 : vector<1x32x32xf32> to vector<32x32xf32>
    %cst_130 = arith.constant dense<0.000000e+00> : vector<2x32xf32>
    %181 = tpu.matmul %174, %180, %cst_130 {dimension_numbers = #tpu.dot_dimension_numbers<[1], [0], [0], [1], [0, 0, 1, 1], [], []>} : vector<2x32xf32>, vector<32x32xf32>, vector<2x32xf32> -> vector<2x32xf32>
    %182 = arith.addf %178, %181 : vector<2x32xf32>
    %c1_131 = arith.constant 1 : index
    %183 = arith.index_cast %c3_i32 : i32 to index
    %c0_132 = arith.constant 0 : index
    %c0_133 = arith.constant 0 : index
    %184 = vector.load %arg1[%c1_131, %183, %c0_132, %c0_133] : memref<4x8x2x32xf32, #tpu.memory_space<vmem>>, vector<1x1x2x32xf32>
    %185 = vector.shape_cast %184 : vector<1x1x2x32xf32> to vector<2x32xf32>
    %c1_134 = arith.constant 1 : index
    %c0_135 = arith.constant 0 : index
    %c0_136 = arith.constant 0 : index
    %186 = vector.load %arg2[%c1_134, %c0_135, %c0_136] : memref<4x32x32xf32, #tpu.memory_space<vmem>>, vector<1x32x32xf32>
    %187 = vector.shape_cast %186 : vector<1x32x32xf32> to vector<32x32xf32>
    %cst_137 = arith.constant dense<0.000000e+00> : vector<2x32xf32>
    %188 = tpu.matmul %174, %187, %cst_137 {dimension_numbers = #tpu.dot_dimension_numbers<[1], [0], [0], [1], [0, 0, 1, 1], [], []>} : vector<2x32xf32>, vector<32x32xf32>, vector<2x32xf32> -> vector<2x32xf32>
    %189 = arith.addf %185, %188 : vector<2x32xf32>
    %c2_138 = arith.constant 2 : index
    %190 = arith.index_cast %c3_i32 : i32 to index
    %c0_139 = arith.constant 0 : index
    %c0_140 = arith.constant 0 : index
    %191 = vector.load %arg1[%c2_138, %190, %c0_139, %c0_140] : memref<4x8x2x32xf32, #tpu.memory_space<vmem>>, vector<1x1x2x32xf32>
    %192 = vector.shape_cast %191 : vector<1x1x2x32xf32> to vector<2x32xf32>
    %c2_141 = arith.constant 2 : index
    %c0_142 = arith.constant 0 : index
    %c0_143 = arith.constant 0 : index
    %193 = vector.load %arg2[%c2_141, %c0_142, %c0_143] : memref<4x32x32xf32, #tpu.memory_space<vmem>>, vector<1x32x32xf32>
    %194 = vector.shape_cast %193 : vector<1x32x32xf32> to vector<32x32xf32>
    %cst_144 = arith.constant dense<0.000000e+00> : vector<2x32xf32>
    %195 = tpu.matmul %174, %194, %cst_144 {dimension_numbers = #tpu.dot_dimension_numbers<[1], [0], [0], [1], [0, 0, 1, 1], [], []>} : vector<2x32xf32>, vector<32x32xf32>, vector<2x32xf32> -> vector<2x32xf32>
    %196 = arith.addf %192, %195 : vector<2x32xf32>
    %c3_145 = arith.constant 3 : index
    %197 = arith.index_cast %c3_i32 : i32 to index
    %c0_146 = arith.constant 0 : index
    %c0_147 = arith.constant 0 : index
    %198 = vector.load %arg1[%c3_145, %197, %c0_146, %c0_147] : memref<4x8x2x32xf32, #tpu.memory_space<vmem>>, vector<1x1x2x32xf32>
    %199 = vector.shape_cast %198 : vector<1x1x2x32xf32> to vector<2x32xf32>
    %c3_148 = arith.constant 3 : index
    %c0_149 = arith.constant 0 : index
    %c0_150 = arith.constant 0 : index
    %200 = vector.load %arg2[%c3_148, %c0_149, %c0_150] : memref<4x32x32xf32, #tpu.memory_space<vmem>>, vector<1x32x32xf32>
    %201 = vector.shape_cast %200 : vector<1x32x32xf32> to vector<32x32xf32>
    %cst_151 = arith.constant dense<0.000000e+00> : vector<2x32xf32>
    %202 = tpu.matmul %174, %201, %cst_151 {dimension_numbers = #tpu.dot_dimension_numbers<[1], [0], [0], [1], [0, 0, 1, 1], [], []>} : vector<2x32xf32>, vector<32x32xf32>, vector<2x32xf32> -> vector<2x32xf32>
    %203 = arith.addf %199, %202 : vector<2x32xf32>
    %204 = arith.negf %182 : vector<2x32xf32>
    %205 = math.exp %204 : vector<2x32xf32>
    %cst_152 = arith.constant 1.000000e+00 : f32
    %206 = vector.broadcast %cst_152 : f32 to vector<2x32xf32>
    %207 = arith.addf %206, %205 : vector<2x32xf32>
    %208 = arith.divf %206, %207 : vector<2x32xf32>
    %209 = arith.negf %189 : vector<2x32xf32>
    %210 = math.exp %209 : vector<2x32xf32>
    %cst_153 = arith.constant 1.000000e+00 : f32
    %211 = vector.broadcast %cst_153 : f32 to vector<2x32xf32>
    %212 = arith.addf %211, %210 : vector<2x32xf32>
    %213 = arith.divf %211, %212 : vector<2x32xf32>
    %214 = math.tanh %196 : vector<2x32xf32>
    %215 = arith.negf %203 : vector<2x32xf32>
    %216 = math.exp %215 : vector<2x32xf32>
    %cst_154 = arith.constant 1.000000e+00 : f32
    %217 = vector.broadcast %cst_154 : f32 to vector<2x32xf32>
    %218 = arith.addf %217, %216 : vector<2x32xf32>
    %219 = arith.divf %217, %218 : vector<2x32xf32>
    %220 = arith.mulf %213, %175 : vector<2x32xf32>
    %221 = arith.mulf %208, %214 : vector<2x32xf32>
    %222 = arith.addf %220, %221 : vector<2x32xf32>
    %223 = math.tanh %222 : vector<2x32xf32>
    %224 = arith.mulf %219, %223 : vector<2x32xf32>
    %c0_155 = arith.constant 0 : index
    %c0_156 = arith.constant 0 : index
    %225 = vector.load %arg5[%c0_155, %c0_156] : memref<2x32xf32, #tpu.memory_space<vmem>>, vector<2x32xf32>
    tpu.vector_store %arg5[%c0_155, %c0_156], %222 {strides = array<i32>} : memref<2x32xf32, #tpu.memory_space<vmem>>, vector<2x32xf32>,
    %c0_157 = arith.constant 0 : index
    %c0_158 = arith.constant 0 : index
    %226 = vector.load %arg4[%c0_157, %c0_158] : memref<2x32xf32, #tpu.memory_space<vmem>>, vector<2x32xf32>
    tpu.vector_store %arg4[%c0_157, %c0_158], %224 {strides = array<i32>} : memref<2x32xf32, #tpu.memory_space<vmem>>, vector<2x32xf32>,
    %227 = arith.index_cast %c3_i32 : i32 to index
    %c0_159 = arith.constant 0 : index
    %c0_160 = arith.constant 0 : index
    %228 = vector.load %arg3[%227, %c0_159, %c0_160] : memref<8x2x32xf32, #tpu.memory_space<vmem>>, vector<1x2x32xf32>
    %229 = vector.shape_cast %228 : vector<1x2x32xf32> to vector<2x32xf32>
    %230 = vector.shape_cast %224 : vector<2x32xf32> to vector<1x2x32xf32>
    tpu.vector_store %arg3[%227, %c0_159, %c0_160], %230 {strides = array<i32>} : memref<8x2x32xf32, #tpu.memory_space<vmem>>, vector<1x2x32xf32>,
    %c4_i32 = arith.constant 4 : i32
    %c0_161 = arith.constant 0 : index
    %c0_162 = arith.constant 0 : index
    %231 = vector.load %arg4[%c0_161, %c0_162] : memref<2x32xf32, #tpu.memory_space<vmem>>, vector<2x32xf32>
    %c0_163 = arith.constant 0 : index
    %c0_164 = arith.constant 0 : index
    %232 = vector.load %arg5[%c0_163, %c0_164] : memref<2x32xf32, #tpu.memory_space<vmem>>, vector<2x32xf32>
    %c0_165 = arith.constant 0 : index
    %233 = arith.index_cast %c4_i32 : i32 to index
    %c0_166 = arith.constant 0 : index
    %c0_167 = arith.constant 0 : index
    %234 = vector.load %arg1[%c0_165, %233, %c0_166, %c0_167] : memref<4x8x2x32xf32, #tpu.memory_space<vmem>>, vector<1x1x2x32xf32>
    %235 = vector.shape_cast %234 : vector<1x1x2x32xf32> to vector<2x32xf32>
    %c0_168 = arith.constant 0 : index
    %c0_169 = arith.constant 0 : index
    %c0_170 = arith.constant 0 : index
    %236 = vector.load %arg2[%c0_168, %c0_169, %c0_170] : memref<4x32x32xf32, #tpu.memory_space<vmem>>, vector<1x32x32xf32>
    %237 = vector.shape_cast %236 : vector<1x32x32xf32> to vector<32x32xf32>
    %cst_171 = arith.constant dense<0.000000e+00> : vector<2x32xf32>
    %238 = tpu.matmul %231, %237, %cst_171 {dimension_numbers = #tpu.dot_dimension_numbers<[1], [0], [0], [1], [0, 0, 1, 1], [], []>} : vector<2x32xf32>, vector<32x32xf32>, vector<2x32xf32> -> vector<2x32xf32>
    %239 = arith.addf %235, %238 : vector<2x32xf32>
    %c1_172 = arith.constant 1 : index
    %240 = arith.index_cast %c4_i32 : i32 to index
    %c0_173 = arith.constant 0 : index
    %c0_174 = arith.constant 0 : index
    %241 = vector.load %arg1[%c1_172, %240, %c0_173, %c0_174] : memref<4x8x2x32xf32, #tpu.memory_space<vmem>>, vector<1x1x2x32xf32>
    %242 = vector.shape_cast %241 : vector<1x1x2x32xf32> to vector<2x32xf32>
    %c1_175 = arith.constant 1 : index
    %c0_176 = arith.constant 0 : index
    %c0_177 = arith.constant 0 : index
    %243 = vector.load %arg2[%c1_175, %c0_176, %c0_177] : memref<4x32x32xf32, #tpu.memory_space<vmem>>, vector<1x32x32xf32>
    %244 = vector.shape_cast %243 : vector<1x32x32xf32> to vector<32x32xf32>
    %cst_178 = arith.constant dense<0.000000e+00> : vector<2x32xf32>
    %245 = tpu.matmul %231, %244, %cst_178 {dimension_numbers = #tpu.dot_dimension_numbers<[1], [0], [0], [1], [0, 0, 1, 1], [], []>} : vector<2x32xf32>, vector<32x32xf32>, vector<2x32xf32> -> vector<2x32xf32>
    %246 = arith.addf %242, %245 : vector<2x32xf32>
    %c2_179 = arith.constant 2 : index
    %247 = arith.index_cast %c4_i32 : i32 to index
    %c0_180 = arith.constant 0 : index
    %c0_181 = arith.constant 0 : index
    %248 = vector.load %arg1[%c2_179, %247, %c0_180, %c0_181] : memref<4x8x2x32xf32, #tpu.memory_space<vmem>>, vector<1x1x2x32xf32>
    %249 = vector.shape_cast %248 : vector<1x1x2x32xf32> to vector<2x32xf32>
    %c2_182 = arith.constant 2 : index
    %c0_183 = arith.constant 0 : index
    %c0_184 = arith.constant 0 : index
    %250 = vector.load %arg2[%c2_182, %c0_183, %c0_184] : memref<4x32x32xf32, #tpu.memory_space<vmem>>, vector<1x32x32xf32>
    %251 = vector.shape_cast %250 : vector<1x32x32xf32> to vector<32x32xf32>
    %cst_185 = arith.constant dense<0.000000e+00> : vector<2x32xf32>
    %252 = tpu.matmul %231, %251, %cst_185 {dimension_numbers = #tpu.dot_dimension_numbers<[1], [0], [0], [1], [0, 0, 1, 1], [], []>} : vector<2x32xf32>, vector<32x32xf32>, vector<2x32xf32> -> vector<2x32xf32>
    %253 = arith.addf %249, %252 : vector<2x32xf32>
    %c3_186 = arith.constant 3 : index
    %254 = arith.index_cast %c4_i32 : i32 to index
    %c0_187 = arith.constant 0 : index
    %c0_188 = arith.constant 0 : index
    %255 = vector.load %arg1[%c3_186, %254, %c0_187, %c0_188] : memref<4x8x2x32xf32, #tpu.memory_space<vmem>>, vector<1x1x2x32xf32>
    %256 = vector.shape_cast %255 : vector<1x1x2x32xf32> to vector<2x32xf32>
    %c3_189 = arith.constant 3 : index
    %c0_190 = arith.constant 0 : index
    %c0_191 = arith.constant 0 : index
    %257 = vector.load %arg2[%c3_189, %c0_190, %c0_191] : memref<4x32x32xf32, #tpu.memory_space<vmem>>, vector<1x32x32xf32>
    %258 = vector.shape_cast %257 : vector<1x32x32xf32> to vector<32x32xf32>
    %cst_192 = arith.constant dense<0.000000e+00> : vector<2x32xf32>
    %259 = tpu.matmul %231, %258, %cst_192 {dimension_numbers = #tpu.dot_dimension_numbers<[1], [0], [0], [1], [0, 0, 1, 1], [], []>} : vector<2x32xf32>, vector<32x32xf32>, vector<2x32xf32> -> vector<2x32xf32>
    %260 = arith.addf %256, %259 : vector<2x32xf32>
    %261 = arith.negf %239 : vector<2x32xf32>
    %262 = math.exp %261 : vector<2x32xf32>
    %cst_193 = arith.constant 1.000000e+00 : f32
    %263 = vector.broadcast %cst_193 : f32 to vector<2x32xf32>
    %264 = arith.addf %263, %262 : vector<2x32xf32>
    %265 = arith.divf %263, %264 : vector<2x32xf32>
    %266 = arith.negf %246 : vector<2x32xf32>
    %267 = math.exp %266 : vector<2x32xf32>
    %cst_194 = arith.constant 1.000000e+00 : f32
    %268 = vector.broadcast %cst_194 : f32 to vector<2x32xf32>
    %269 = arith.addf %268, %267 : vector<2x32xf32>
    %270 = arith.divf %268, %269 : vector<2x32xf32>
    %271 = math.tanh %253 : vector<2x32xf32>
    %272 = arith.negf %260 : vector<2x32xf32>
    %273 = math.exp %272 : vector<2x32xf32>
    %cst_195 = arith.constant 1.000000e+00 : f32
    %274 = vector.broadcast %cst_195 : f32 to vector<2x32xf32>
    %275 = arith.addf %274, %273 : vector<2x32xf32>
    %276 = arith.divf %274, %275 : vector<2x32xf32>
    %277 = arith.mulf %270, %232 : vector<2x32xf32>
    %278 = arith.mulf %265, %271 : vector<2x32xf32>
    %279 = arith.addf %277, %278 : vector<2x32xf32>
    %280 = math.tanh %279 : vector<2x32xf32>
    %281 = arith.mulf %276, %280 : vector<2x32xf32>
    %c0_196 = arith.constant 0 : index
    %c0_197 = arith.constant 0 : index
    %282 = vector.load %arg5[%c0_196, %c0_197] : memref<2x32xf32, #tpu.memory_space<vmem>>, vector<2x32xf32>
    tpu.vector_store %arg5[%c0_196, %c0_197], %279 {strides = array<i32>} : memref<2x32xf32, #tpu.memory_space<vmem>>, vector<2x32xf32>,
    %c0_198 = arith.constant 0 : index
    %c0_199 = arith.constant 0 : index
    %283 = vector.load %arg4[%c0_198, %c0_199] : memref<2x32xf32, #tpu.memory_space<vmem>>, vector<2x32xf32>
    tpu.vector_store %arg4[%c0_198, %c0_199], %281 {strides = array<i32>} : memref<2x32xf32, #tpu.memory_space<vmem>>, vector<2x32xf32>,
    %284 = arith.index_cast %c4_i32 : i32 to index
    %c0_200 = arith.constant 0 : index
    %c0_201 = arith.constant 0 : index
    %285 = vector.load %arg3[%284, %c0_200, %c0_201] : memref<8x2x32xf32, #tpu.memory_space<vmem>>, vector<1x2x32xf32>
    %286 = vector.shape_cast %285 : vector<1x2x32xf32> to vector<2x32xf32>
    %287 = vector.shape_cast %281 : vector<2x32xf32> to vector<1x2x32xf32>
    tpu.vector_store %arg3[%284, %c0_200, %c0_201], %287 {strides = array<i32>} : memref<8x2x32xf32, #tpu.memory_space<vmem>>, vector<1x2x32xf32>,
    %c5_i32 = arith.constant 5 : i32
    %c0_202 = arith.constant 0 : index
    %c0_203 = arith.constant 0 : index
    %288 = vector.load %arg4[%c0_202, %c0_203] : memref<2x32xf32, #tpu.memory_space<vmem>>, vector<2x32xf32>
    %c0_204 = arith.constant 0 : index
    %c0_205 = arith.constant 0 : index
    %289 = vector.load %arg5[%c0_204, %c0_205] : memref<2x32xf32, #tpu.memory_space<vmem>>, vector<2x32xf32>
    %c0_206 = arith.constant 0 : index
    %290 = arith.index_cast %c5_i32 : i32 to index
    %c0_207 = arith.constant 0 : index
    %c0_208 = arith.constant 0 : index
    %291 = vector.load %arg1[%c0_206, %290, %c0_207, %c0_208] : memref<4x8x2x32xf32, #tpu.memory_space<vmem>>, vector<1x1x2x32xf32>
    %292 = vector.shape_cast %291 : vector<1x1x2x32xf32> to vector<2x32xf32>
    %c0_209 = arith.constant 0 : index
    %c0_210 = arith.constant 0 : index
    %c0_211 = arith.constant 0 : index
    %293 = vector.load %arg2[%c0_209, %c0_210, %c0_211] : memref<4x32x32xf32, #tpu.memory_space<vmem>>, vector<1x32x32xf32>
    %294 = vector.shape_cast %293 : vector<1x32x32xf32> to vector<32x32xf32>
    %cst_212 = arith.constant dense<0.000000e+00> : vector<2x32xf32>
    %295 = tpu.matmul %288, %294, %cst_212 {dimension_numbers = #tpu.dot_dimension_numbers<[1], [0], [0], [1], [0, 0, 1, 1], [], []>} : vector<2x32xf32>, vector<32x32xf32>, vector<2x32xf32> -> vector<2x32xf32>
    %296 = arith.addf %292, %295 : vector<2x32xf32>
    %c1_213 = arith.constant 1 : index
    %297 = arith.index_cast %c5_i32 : i32 to index
    %c0_214 = arith.constant 0 : index
    %c0_215 = arith.constant 0 : index
    %298 = vector.load %arg1[%c1_213, %297, %c0_214, %c0_215] : memref<4x8x2x32xf32, #tpu.memory_space<vmem>>, vector<1x1x2x32xf32>
    %299 = vector.shape_cast %298 : vector<1x1x2x32xf32> to vector<2x32xf32>
    %c1_216 = arith.constant 1 : index
    %c0_217 = arith.constant 0 : index
    %c0_218 = arith.constant 0 : index
    %300 = vector.load %arg2[%c1_216, %c0_217, %c0_218] : memref<4x32x32xf32, #tpu.memory_space<vmem>>, vector<1x32x32xf32>
    %301 = vector.shape_cast %300 : vector<1x32x32xf32> to vector<32x32xf32>
    %cst_219 = arith.constant dense<0.000000e+00> : vector<2x32xf32>
    %302 = tpu.matmul %288, %301, %cst_219 {dimension_numbers = #tpu.dot_dimension_numbers<[1], [0], [0], [1], [0, 0, 1, 1], [], []>} : vector<2x32xf32>, vector<32x32xf32>, vector<2x32xf32> -> vector<2x32xf32>
    %303 = arith.addf %299, %302 : vector<2x32xf32>
    %c2_220 = arith.constant 2 : index
    %304 = arith.index_cast %c5_i32 : i32 to index
    %c0_221 = arith.constant 0 : index
    %c0_222 = arith.constant 0 : index
    %305 = vector.load %arg1[%c2_220, %304, %c0_221, %c0_222] : memref<4x8x2x32xf32, #tpu.memory_space<vmem>>, vector<1x1x2x32xf32>
    %306 = vector.shape_cast %305 : vector<1x1x2x32xf32> to vector<2x32xf32>
    %c2_223 = arith.constant 2 : index
    %c0_224 = arith.constant 0 : index
    %c0_225 = arith.constant 0 : index
    %307 = vector.load %arg2[%c2_223, %c0_224, %c0_225] : memref<4x32x32xf32, #tpu.memory_space<vmem>>, vector<1x32x32xf32>
    %308 = vector.shape_cast %307 : vector<1x32x32xf32> to vector<32x32xf32>
    %cst_226 = arith.constant dense<0.000000e+00> : vector<2x32xf32>
    %309 = tpu.matmul %288, %308, %cst_226 {dimension_numbers = #tpu.dot_dimension_numbers<[1], [0], [0], [1], [0, 0, 1, 1], [], []>} : vector<2x32xf32>, vector<32x32xf32>, vector<2x32xf32> -> vector<2x32xf32>
    %310 = arith.addf %306, %309 : vector<2x32xf32>
    %c3_227 = arith.constant 3 : index
    %311 = arith.index_cast %c5_i32 : i32 to index
    %c0_228 = arith.constant 0 : index
    %c0_229 = arith.constant 0 : index
    %312 = vector.load %arg1[%c3_227, %311, %c0_228, %c0_229] : memref<4x8x2x32xf32, #tpu.memory_space<vmem>>, vector<1x1x2x32xf32>
    %313 = vector.shape_cast %312 : vector<1x1x2x32xf32> to vector<2x32xf32>
    %c3_230 = arith.constant 3 : index
    %c0_231 = arith.constant 0 : index
    %c0_232 = arith.constant 0 : index
    %314 = vector.load %arg2[%c3_230, %c0_231, %c0_232] : memref<4x32x32xf32, #tpu.memory_space<vmem>>, vector<1x32x32xf32>
    %315 = vector.shape_cast %314 : vector<1x32x32xf32> to vector<32x32xf32>
    %cst_233 = arith.constant dense<0.000000e+00> : vector<2x32xf32>
    %316 = tpu.matmul %288, %315, %cst_233 {dimension_numbers = #tpu.dot_dimension_numbers<[1], [0], [0], [1], [0, 0, 1, 1], [], []>} : vector<2x32xf32>, vector<32x32xf32>, vector<2x32xf32> -> vector<2x32xf32>
    %317 = arith.addf %313, %316 : vector<2x32xf32>
    %318 = arith.negf %296 : vector<2x32xf32>
    %319 = math.exp %318 : vector<2x32xf32>
    %cst_234 = arith.constant 1.000000e+00 : f32
    %320 = vector.broadcast %cst_234 : f32 to vector<2x32xf32>
    %321 = arith.addf %320, %319 : vector<2x32xf32>
    %322 = arith.divf %320, %321 : vector<2x32xf32>
    %323 = arith.negf %303 : vector<2x32xf32>
    %324 = math.exp %323 : vector<2x32xf32>
    %cst_235 = arith.constant 1.000000e+00 : f32
    %325 = vector.broadcast %cst_235 : f32 to vector<2x32xf32>
    %326 = arith.addf %325, %324 : vector<2x32xf32>
    %327 = arith.divf %325, %326 : vector<2x32xf32>
    %328 = math.tanh %310 : vector<2x32xf32>
    %329 = arith.negf %317 : vector<2x32xf32>
    %330 = math.exp %329 : vector<2x32xf32>
    %cst_236 = arith.constant 1.000000e+00 : f32
    %331 = vector.broadcast %cst_236 : f32 to vector<2x32xf32>
    %332 = arith.addf %331, %330 : vector<2x32xf32>
    %333 = arith.divf %331, %332 : vector<2x32xf32>
    %334 = arith.mulf %327, %289 : vector<2x32xf32>
    %335 = arith.mulf %322, %328 : vector<2x32xf32>
    %336 = arith.addf %334, %335 : vector<2x32xf32>
    %337 = math.tanh %336 : vector<2x32xf32>
    %338 = arith.mulf %333, %337 : vector<2x32xf32>
    %c0_237 = arith.constant 0 : index
    %c0_238 = arith.constant 0 : index
    %339 = vector.load %arg5[%c0_237, %c0_238] : memref<2x32xf32, #tpu.memory_space<vmem>>, vector<2x32xf32>
    tpu.vector_store %arg5[%c0_237, %c0_238], %336 {strides = array<i32>} : memref<2x32xf32, #tpu.memory_space<vmem>>, vector<2x32xf32>,
    %c0_239 = arith.constant 0 : index
    %c0_240 = arith.constant 0 : index
    %340 = vector.load %arg4[%c0_239, %c0_240] : memref<2x32xf32, #tpu.memory_space<vmem>>, vector<2x32xf32>
    tpu.vector_store %arg4[%c0_239, %c0_240], %338 {strides = array<i32>} : memref<2x32xf32, #tpu.memory_space<vmem>>, vector<2x32xf32>,
    %341 = arith.index_cast %c5_i32 : i32 to index
    %c0_241 = arith.constant 0 : index
    %c0_242 = arith.constant 0 : index
    %342 = vector.load %arg3[%341, %c0_241, %c0_242] : memref<8x2x32xf32, #tpu.memory_space<vmem>>, vector<1x2x32xf32>
    %343 = vector.shape_cast %342 : vector<1x2x32xf32> to vector<2x32xf32>
    %344 = vector.shape_cast %338 : vector<2x32xf32> to vector<1x2x32xf32>
    tpu.vector_store %arg3[%341, %c0_241, %c0_242], %344 {strides = array<i32>} : memref<8x2x32xf32, #tpu.memory_space<vmem>>, vector<1x2x32xf32>,
    %c6_i32 = arith.constant 6 : i32
    %c0_243 = arith.constant 0 : index
    %c0_244 = arith.constant 0 : index
    %345 = vector.load %arg4[%c0_243, %c0_244] : memref<2x32xf32, #tpu.memory_space<vmem>>, vector<2x32xf32>
    %c0_245 = arith.constant 0 : index
    %c0_246 = arith.constant 0 : index
    %346 = vector.load %arg5[%c0_245, %c0_246] : memref<2x32xf32, #tpu.memory_space<vmem>>, vector<2x32xf32>
    %c0_247 = arith.constant 0 : index
    %347 = arith.index_cast %c6_i32 : i32 to index
    %c0_248 = arith.constant 0 : index
    %c0_249 = arith.constant 0 : index
    %348 = vector.load %arg1[%c0_247, %347, %c0_248, %c0_249] : memref<4x8x2x32xf32, #tpu.memory_space<vmem>>, vector<1x1x2x32xf32>
    %349 = vector.shape_cast %348 : vector<1x1x2x32xf32> to vector<2x32xf32>
    %c0_250 = arith.constant 0 : index
    %c0_251 = arith.constant 0 : index
    %c0_252 = arith.constant 0 : index
    %350 = vector.load %arg2[%c0_250, %c0_251, %c0_252] : memref<4x32x32xf32, #tpu.memory_space<vmem>>, vector<1x32x32xf32>
    %351 = vector.shape_cast %350 : vector<1x32x32xf32> to vector<32x32xf32>
    %cst_253 = arith.constant dense<0.000000e+00> : vector<2x32xf32>
    %352 = tpu.matmul %345, %351, %cst_253 {dimension_numbers = #tpu.dot_dimension_numbers<[1], [0], [0], [1], [0, 0, 1, 1], [], []>} : vector<2x32xf32>, vector<32x32xf32>, vector<2x32xf32> -> vector<2x32xf32>
    %353 = arith.addf %349, %352 : vector<2x32xf32>
    %c1_254 = arith.constant 1 : index
    %354 = arith.index_cast %c6_i32 : i32 to index
    %c0_255 = arith.constant 0 : index
    %c0_256 = arith.constant 0 : index
    %355 = vector.load %arg1[%c1_254, %354, %c0_255, %c0_256] : memref<4x8x2x32xf32, #tpu.memory_space<vmem>>, vector<1x1x2x32xf32>
    %356 = vector.shape_cast %355 : vector<1x1x2x32xf32> to vector<2x32xf32>
    %c1_257 = arith.constant 1 : index
    %c0_258 = arith.constant 0 : index
    %c0_259 = arith.constant 0 : index
    %357 = vector.load %arg2[%c1_257, %c0_258, %c0_259] : memref<4x32x32xf32, #tpu.memory_space<vmem>>, vector<1x32x32xf32>
    %358 = vector.shape_cast %357 : vector<1x32x32xf32> to vector<32x32xf32>
    %cst_260 = arith.constant dense<0.000000e+00> : vector<2x32xf32>
    %359 = tpu.matmul %345, %358, %cst_260 {dimension_numbers = #tpu.dot_dimension_numbers<[1], [0], [0], [1], [0, 0, 1, 1], [], []>} : vector<2x32xf32>, vector<32x32xf32>, vector<2x32xf32> -> vector<2x32xf32>
    %360 = arith.addf %356, %359 : vector<2x32xf32>
    %c2_261 = arith.constant 2 : index
    %361 = arith.index_cast %c6_i32 : i32 to index
    %c0_262 = arith.constant 0 : index
    %c0_263 = arith.constant 0 : index
    %362 = vector.load %arg1[%c2_261, %361, %c0_262, %c0_263] : memref<4x8x2x32xf32, #tpu.memory_space<vmem>>, vector<1x1x2x32xf32>
    %363 = vector.shape_cast %362 : vector<1x1x2x32xf32> to vector<2x32xf32>
    %c2_264 = arith.constant 2 : index
    %c0_265 = arith.constant 0 : index
    %c0_266 = arith.constant 0 : index
    %364 = vector.load %arg2[%c2_264, %c0_265, %c0_266] : memref<4x32x32xf32, #tpu.memory_space<vmem>>, vector<1x32x32xf32>
    %365 = vector.shape_cast %364 : vector<1x32x32xf32> to vector<32x32xf32>
    %cst_267 = arith.constant dense<0.000000e+00> : vector<2x32xf32>
    %366 = tpu.matmul %345, %365, %cst_267 {dimension_numbers = #tpu.dot_dimension_numbers<[1], [0], [0], [1], [0, 0, 1, 1], [], []>} : vector<2x32xf32>, vector<32x32xf32>, vector<2x32xf32> -> vector<2x32xf32>
    %367 = arith.addf %363, %366 : vector<2x32xf32>
    %c3_268 = arith.constant 3 : index
    %368 = arith.index_cast %c6_i32 : i32 to index
    %c0_269 = arith.constant 0 : index
    %c0_270 = arith.constant 0 : index
    %369 = vector.load %arg1[%c3_268, %368, %c0_269, %c0_270] : memref<4x8x2x32xf32, #tpu.memory_space<vmem>>, vector<1x1x2x32xf32>
    %370 = vector.shape_cast %369 : vector<1x1x2x32xf32> to vector<2x32xf32>
    %c3_271 = arith.constant 3 : index
    %c0_272 = arith.constant 0 : index
    %c0_273 = arith.constant 0 : index
    %371 = vector.load %arg2[%c3_271, %c0_272, %c0_273] : memref<4x32x32xf32, #tpu.memory_space<vmem>>, vector<1x32x32xf32>
    %372 = vector.shape_cast %371 : vector<1x32x32xf32> to vector<32x32xf32>
    %cst_274 = arith.constant dense<0.000000e+00> : vector<2x32xf32>
    %373 = tpu.matmul %345, %372, %cst_274 {dimension_numbers = #tpu.dot_dimension_numbers<[1], [0], [0], [1], [0, 0, 1, 1], [], []>} : vector<2x32xf32>, vector<32x32xf32>, vector<2x32xf32> -> vector<2x32xf32>
    %374 = arith.addf %370, %373 : vector<2x32xf32>
    %375 = arith.negf %353 : vector<2x32xf32>
    %376 = math.exp %375 : vector<2x32xf32>
    %cst_275 = arith.constant 1.000000e+00 : f32
    %377 = vector.broadcast %cst_275 : f32 to vector<2x32xf32>
    %378 = arith.addf %377, %376 : vector<2x32xf32>
    %379 = arith.divf %377, %378 : vector<2x32xf32>
    %380 = arith.negf %360 : vector<2x32xf32>
    %381 = math.exp %380 : vector<2x32xf32>
    %cst_276 = arith.constant 1.000000e+00 : f32
    %382 = vector.broadcast %cst_276 : f32 to vector<2x32xf32>
    %383 = arith.addf %382, %381 : vector<2x32xf32>
    %384 = arith.divf %382, %383 : vector<2x32xf32>
    %385 = math.tanh %367 : vector<2x32xf32>
    %386 = arith.negf %374 : vector<2x32xf32>
    %387 = math.exp %386 : vector<2x32xf32>
    %cst_277 = arith.constant 1.000000e+00 : f32
    %388 = vector.broadcast %cst_277 : f32 to vector<2x32xf32>
    %389 = arith.addf %388, %387 : vector<2x32xf32>
    %390 = arith.divf %388, %389 : vector<2x32xf32>
    %391 = arith.mulf %384, %346 : vector<2x32xf32>
    %392 = arith.mulf %379, %385 : vector<2x32xf32>
    %393 = arith.addf %391, %392 : vector<2x32xf32>
    %394 = math.tanh %393 : vector<2x32xf32>
    %395 = arith.mulf %390, %394 : vector<2x32xf32>
    %c0_278 = arith.constant 0 : index
    %c0_279 = arith.constant 0 : index
    %396 = vector.load %arg5[%c0_278, %c0_279] : memref<2x32xf32, #tpu.memory_space<vmem>>, vector<2x32xf32>
    tpu.vector_store %arg5[%c0_278, %c0_279], %393 {strides = array<i32>} : memref<2x32xf32, #tpu.memory_space<vmem>>, vector<2x32xf32>,
    %c0_280 = arith.constant 0 : index
    %c0_281 = arith.constant 0 : index
    %397 = vector.load %arg4[%c0_280, %c0_281] : memref<2x32xf32, #tpu.memory_space<vmem>>, vector<2x32xf32>
    tpu.vector_store %arg4[%c0_280, %c0_281], %395 {strides = array<i32>} : memref<2x32xf32, #tpu.memory_space<vmem>>, vector<2x32xf32>,
    %398 = arith.index_cast %c6_i32 : i32 to index
    %c0_282 = arith.constant 0 : index
    %c0_283 = arith.constant 0 : index
    %399 = vector.load %arg3[%398, %c0_282, %c0_283] : memref<8x2x32xf32, #tpu.memory_space<vmem>>, vector<1x2x32xf32>
    %400 = vector.shape_cast %399 : vector<1x2x32xf32> to vector<2x32xf32>
    %401 = vector.shape_cast %395 : vector<2x32xf32> to vector<1x2x32xf32>
    tpu.vector_store %arg3[%398, %c0_282, %c0_283], %401 {strides = array<i32>} : memref<8x2x32xf32, #tpu.memory_space<vmem>>, vector<1x2x32xf32>,
    %c7_i32 = arith.constant 7 : i32
    %c0_284 = arith.constant 0 : index
    %c0_285 = arith.constant 0 : index
    %402 = vector.load %arg4[%c0_284, %c0_285] : memref<2x32xf32, #tpu.memory_space<vmem>>, vector<2x32xf32>
    %c0_286 = arith.constant 0 : index
    %c0_287 = arith.constant 0 : index
    %403 = vector.load %arg5[%c0_286, %c0_287] : memref<2x32xf32, #tpu.memory_space<vmem>>, vector<2x32xf32>
    %c0_288 = arith.constant 0 : index
    %404 = arith.index_cast %c7_i32 : i32 to index
    %c0_289 = arith.constant 0 : index
    %c0_290 = arith.constant 0 : index
    %405 = vector.load %arg1[%c0_288, %404, %c0_289, %c0_290] : memref<4x8x2x32xf32, #tpu.memory_space<vmem>>, vector<1x1x2x32xf32>
    %406 = vector.shape_cast %405 : vector<1x1x2x32xf32> to vector<2x32xf32>
    %c0_291 = arith.constant 0 : index
    %c0_292 = arith.constant 0 : index
    %c0_293 = arith.constant 0 : index
    %407 = vector.load %arg2[%c0_291, %c0_292, %c0_293] : memref<4x32x32xf32, #tpu.memory_space<vmem>>, vector<1x32x32xf32>
    %408 = vector.shape_cast %407 : vector<1x32x32xf32> to vector<32x32xf32>
    %cst_294 = arith.constant dense<0.000000e+00> : vector<2x32xf32>
    %409 = tpu.matmul %402, %408, %cst_294 {dimension_numbers = #tpu.dot_dimension_numbers<[1], [0], [0], [1], [0, 0, 1, 1], [], []>} : vector<2x32xf32>, vector<32x32xf32>, vector<2x32xf32> -> vector<2x32xf32>
    %410 = arith.addf %406, %409 : vector<2x32xf32>
    %c1_295 = arith.constant 1 : index
    %411 = arith.index_cast %c7_i32 : i32 to index
    %c0_296 = arith.constant 0 : index
    %c0_297 = arith.constant 0 : index
    %412 = vector.load %arg1[%c1_295, %411, %c0_296, %c0_297] : memref<4x8x2x32xf32, #tpu.memory_space<vmem>>, vector<1x1x2x32xf32>
    %413 = vector.shape_cast %412 : vector<1x1x2x32xf32> to vector<2x32xf32>
    %c1_298 = arith.constant 1 : index
    %c0_299 = arith.constant 0 : index
    %c0_300 = arith.constant 0 : index
    %414 = vector.load %arg2[%c1_298, %c0_299, %c0_300] : memref<4x32x32xf32, #tpu.memory_space<vmem>>, vector<1x32x32xf32>
    %415 = vector.shape_cast %414 : vector<1x32x32xf32> to vector<32x32xf32>
    %cst_301 = arith.constant dense<0.000000e+00> : vector<2x32xf32>
    %416 = tpu.matmul %402, %415, %cst_301 {dimension_numbers = #tpu.dot_dimension_numbers<[1], [0], [0], [1], [0, 0, 1, 1], [], []>} : vector<2x32xf32>, vector<32x32xf32>, vector<2x32xf32> -> vector<2x32xf32>
    %417 = arith.addf %413, %416 : vector<2x32xf32>
    %c2_302 = arith.constant 2 : index
    %418 = arith.index_cast %c7_i32 : i32 to index
    %c0_303 = arith.constant 0 : index
    %c0_304 = arith.constant 0 : index
    %419 = vector.load %arg1[%c2_302, %418, %c0_303, %c0_304] : memref<4x8x2x32xf32, #tpu.memory_space<vmem>>, vector<1x1x2x32xf32>
    %420 = vector.shape_cast %419 : vector<1x1x2x32xf32> to vector<2x32xf32>
    %c2_305 = arith.constant 2 : index
    %c0_306 = arith.constant 0 : index
    %c0_307 = arith.constant 0 : index
    %421 = vector.load %arg2[%c2_305, %c0_306, %c0_307] : memref<4x32x32xf32, #tpu.memory_space<vmem>>, vector<1x32x32xf32>
    %422 = vector.shape_cast %421 : vector<1x32x32xf32> to vector<32x32xf32>
    %cst_308 = arith.constant dense<0.000000e+00> : vector<2x32xf32>
    %423 = tpu.matmul %402, %422, %cst_308 {dimension_numbers = #tpu.dot_dimension_numbers<[1], [0], [0], [1], [0, 0, 1, 1], [], []>} : vector<2x32xf32>, vector<32x32xf32>, vector<2x32xf32> -> vector<2x32xf32>
    %424 = arith.addf %420, %423 : vector<2x32xf32>
    %c3_309 = arith.constant 3 : index
    %425 = arith.index_cast %c7_i32 : i32 to index
    %c0_310 = arith.constant 0 : index
    %c0_311 = arith.constant 0 : index
    %426 = vector.load %arg1[%c3_309, %425, %c0_310, %c0_311] : memref<4x8x2x32xf32, #tpu.memory_space<vmem>>, vector<1x1x2x32xf32>
    %427 = vector.shape_cast %426 : vector<1x1x2x32xf32> to vector<2x32xf32>
    %c3_312 = arith.constant 3 : index
    %c0_313 = arith.constant 0 : index
    %c0_314 = arith.constant 0 : index
    %428 = vector.load %arg2[%c3_312, %c0_313, %c0_314] : memref<4x32x32xf32, #tpu.memory_space<vmem>>, vector<1x32x32xf32>
    %429 = vector.shape_cast %428 : vector<1x32x32xf32> to vector<32x32xf32>
    %cst_315 = arith.constant dense<0.000000e+00> : vector<2x32xf32>
    %430 = tpu.matmul %402, %429, %cst_315 {dimension_numbers = #tpu.dot_dimension_numbers<[1], [0], [0], [1], [0, 0, 1, 1], [], []>} : vector<2x32xf32>, vector<32x32xf32>, vector<2x32xf32> -> vector<2x32xf32>
    %431 = arith.addf %427, %430 : vector<2x32xf32>
    %432 = arith.negf %410 : vector<2x32xf32>
    %433 = math.exp %432 : vector<2x32xf32>
    %cst_316 = arith.constant 1.000000e+00 : f32
    %434 = vector.broadcast %cst_316 : f32 to vector<2x32xf32>
    %435 = arith.addf %434, %433 : vector<2x32xf32>
    %436 = arith.divf %434, %435 : vector<2x32xf32>
    %437 = arith.negf %417 : vector<2x32xf32>
    %438 = math.exp %437 : vector<2x32xf32>
    %cst_317 = arith.constant 1.000000e+00 : f32
    %439 = vector.broadcast %cst_317 : f32 to vector<2x32xf32>
    %440 = arith.addf %439, %438 : vector<2x32xf32>
    %441 = arith.divf %439, %440 : vector<2x32xf32>
    %442 = math.tanh %424 : vector<2x32xf32>
    %443 = arith.negf %431 : vector<2x32xf32>
    %444 = math.exp %443 : vector<2x32xf32>
    %cst_318 = arith.constant 1.000000e+00 : f32
    %445 = vector.broadcast %cst_318 : f32 to vector<2x32xf32>
    %446 = arith.addf %445, %444 : vector<2x32xf32>
    %447 = arith.divf %445, %446 : vector<2x32xf32>
    %448 = arith.mulf %441, %403 : vector<2x32xf32>
    %449 = arith.mulf %436, %442 : vector<2x32xf32>
    %450 = arith.addf %448, %449 : vector<2x32xf32>
    %451 = math.tanh %450 : vector<2x32xf32>
    %452 = arith.mulf %447, %451 : vector<2x32xf32>
    %c0_319 = arith.constant 0 : index
    %c0_320 = arith.constant 0 : index
    %453 = vector.load %arg5[%c0_319, %c0_320] : memref<2x32xf32, #tpu.memory_space<vmem>>, vector<2x32xf32>
    tpu.vector_store %arg5[%c0_319, %c0_320], %450 {strides = array<i32>} : memref<2x32xf32, #tpu.memory_space<vmem>>, vector<2x32xf32>,
    %c0_321 = arith.constant 0 : index
    %c0_322 = arith.constant 0 : index
    %454 = vector.load %arg4[%c0_321, %c0_322] : memref<2x32xf32, #tpu.memory_space<vmem>>, vector<2x32xf32>
    tpu.vector_store %arg4[%c0_321, %c0_322], %452 {strides = array<i32>} : memref<2x32xf32, #tpu.memory_space<vmem>>, vector<2x32xf32>,
    %455 = arith.index_cast %c7_i32 : i32 to index
    %c0_323 = arith.constant 0 : index
    %c0_324 = arith.constant 0 : index
    %456 = vector.load %arg3[%455, %c0_323, %c0_324] : memref<8x2x32xf32, #tpu.memory_space<vmem>>, vector<1x2x32xf32>
    %457 = vector.shape_cast %456 : vector<1x2x32xf32> to vector<2x32xf32>
    %458 = vector.shape_cast %452 : vector<2x32xf32> to vector<1x2x32xf32>
    tpu.vector_store %arg3[%455, %c0_323, %c0_324], %458 {strides = array<i32>} : memref<8x2x32xf32, #tpu.memory_space<vmem>>, vector<1x2x32xf32>,
    %c8_i32 = arith.constant 8 : i32
    return
  }
  func.func @transform_0(%arg0: i32) -> (i32, i32, i32, i32) {
    %c0_i32 = arith.constant 0 : i32
    %c0_i32_0 = arith.constant 0 : i32
    %c0_i32_1 = arith.constant 0 : i32
    %c0_i32_2 = arith.constant 0 : i32
    return %c0_i32, %arg0, %c0_i32_0, %c0_i32_1 : i32, i32, i32, i32
  }
  func.func @transform_1(%arg0: i32) -> (i32, i32, i32) {
    %c0_i32 = arith.constant 0 : i32
    %c0_i32_0 = arith.constant 0 : i32
    %c0_i32_1 = arith.constant 0 : i32
    %c0_i32_2 = arith.constant 0 : i32
    return %c0_i32, %c0_i32_0, %c0_i32_1 : i32, i32, i32
  }
  func.func @transform_2(%arg0: i32) -> (i32, i32, i32) {
    %c0_i32 = arith.constant 0 : i32
    %c0_i32_0 = arith.constant 0 : i32
    %c0_i32_1 = arith.constant 0 : i32
    return %arg0, %c0_i32, %c0_i32_0 : i32, i32, i32
  }
}

module attributes {stable_mosaic.version = 11 : i64} {
  func.func @_fused_fc_kernel(%arg0: i32, %arg1: memref<16x32xf32, #tpu.memory_space<vmem>>, %arg2: memref<32x256xf32, #tpu.memory_space<vmem>>, %arg3: memref<1x256xf32, #tpu.memory_space<vmem>>, %arg4: memref<256x16xf32, #tpu.memory_space<vmem>>, %arg5: memref<1x16xf32, #tpu.memory_space<vmem>>, %arg6: memref<16x16xf32, #tpu.memory_space<vmem>>) attributes {dimension_semantics = [#tpu.dimension_semantics<parallel>], iteration_bounds = array<i64: 1>, scalar_prefetch = 0 : i64, scratch_operands = 0 : i64, tpu.core_type = #tpu.core_type<tc>, window_params = [{transform_indices = @transform_0, window_bounds = array<i64: 16, 32>}, {pipeline_mode = #tpu.pipeline_mode<synchronous>, transform_indices = @transform_1, window_bounds = array<i64: 32, 256>}, {pipeline_mode = #tpu.pipeline_mode<synchronous>, transform_indices = @transform_2, window_bounds = array<i64: 1, 256>}, {pipeline_mode = #tpu.pipeline_mode<synchronous>, transform_indices = @transform_3, window_bounds = array<i64: 256, 16>}, {pipeline_mode = #tpu.pipeline_mode<synchronous>, transform_indices = @transform_4, window_bounds = array<i64: 1, 16>}, {transform_indices = @transform_5, window_bounds = array<i64: 16, 16>}]} {
    %c0 = arith.constant 0 : index
    %c0_0 = arith.constant 0 : index
    %0 = vector.load %arg1[%c0, %c0_0] : memref<16x32xf32, #tpu.memory_space<vmem>>, vector<16x32xf32>
    %c0_1 = arith.constant 0 : index
    %c0_2 = arith.constant 0 : index
    %1 = vector.load %arg2[%c0_1, %c0_2] : memref<32x256xf32, #tpu.memory_space<vmem>>, vector<32x256xf32>
    %cst = arith.constant dense<0.000000e+00> : vector<16x256xf32>
    %2 = tpu.matmul %0, %1, %cst {dimension_numbers = #tpu.dot_dimension_numbers<[1], [0], [0], [1], [0, 0, 1, 1], [], []>} : vector<16x32xf32>, vector<32x256xf32>, vector<16x256xf32> -> vector<16x256xf32>
    %c0_3 = arith.constant 0 : index
    %c0_4 = arith.constant 0 : index
    %3 = vector.load %arg3[%c0_3, %c0_4] : memref<1x256xf32, #tpu.memory_space<vmem>>, vector<1x256xf32>
    %4 = vector.broadcast %3 : vector<1x256xf32> to vector<16x256xf32>
    %5 = arith.addf %2, %4 : vector<16x256xf32>
    %c0_5 = arith.constant 0 : index
    %c0_6 = arith.constant 0 : index
    %6 = vector.load %arg4[%c0_5, %c0_6] : memref<256x16xf32, #tpu.memory_space<vmem>>, vector<256x16xf32>
    %cst_7 = arith.constant dense<0.000000e+00> : vector<16x16xf32>
    %7 = tpu.matmul %5, %6, %cst_7 {dimension_numbers = #tpu.dot_dimension_numbers<[1], [0], [0], [1], [0, 0, 1, 1], [], []>} : vector<16x256xf32>, vector<256x16xf32>, vector<16x16xf32> -> vector<16x16xf32>
    %c0_8 = arith.constant 0 : index
    %c0_9 = arith.constant 0 : index
    %8 = vector.load %arg5[%c0_8, %c0_9] : memref<1x16xf32, #tpu.memory_space<vmem>>, vector<1x16xf32>
    %9 = vector.broadcast %8 : vector<1x16xf32> to vector<16x16xf32>
    %10 = arith.addf %7, %9 : vector<16x16xf32>
    %c0_10 = arith.constant 0 : index
    %c0_11 = arith.constant 0 : index
    %11 = vector.load %arg6[%c0_10, %c0_11] : memref<16x16xf32, #tpu.memory_space<vmem>>, vector<16x16xf32>
    tpu.vector_store %arg6[%c0_10, %c0_11], %10 {strides = array<i32>} : memref<16x16xf32, #tpu.memory_space<vmem>>, vector<16x16xf32>,
    return
  }
  func.func @transform_0(%arg0: i32) -> (i32, i32) {
    %c0_i32 = arith.constant 0 : i32
    %c0_i32_0 = arith.constant 0 : i32
    return %arg0, %c0_i32 : i32, i32
  }
  func.func @transform_1(%arg0: i32) -> (i32, i32) {
    %c0_i32 = arith.constant 0 : i32
    %c0_i32_0 = arith.constant 0 : i32
    %c0_i32_1 = arith.constant 0 : i32
    return %c0_i32, %c0_i32_0 : i32, i32
  }
  func.func @transform_2(%arg0: i32) -> (i32, i32) {
    %c0_i32 = arith.constant 0 : i32
    %c0_i32_0 = arith.constant 0 : i32
    %c0_i32_1 = arith.constant 0 : i32
    return %c0_i32, %c0_i32_0 : i32, i32
  }
  func.func @transform_3(%arg0: i32) -> (i32, i32) {
    %c0_i32 = arith.constant 0 : i32
    %c0_i32_0 = arith.constant 0 : i32
    %c0_i32_1 = arith.constant 0 : i32
    return %c0_i32, %c0_i32_0 : i32, i32
  }
  func.func @transform_4(%arg0: i32) -> (i32, i32) {
    %c0_i32 = arith.constant 0 : i32
    %c0_i32_0 = arith.constant 0 : i32
    %c0_i32_1 = arith.constant 0 : i32
    return %c0_i32, %c0_i32_0 : i32, i32
  }
  func.func @transform_5(%arg0: i32) -> (i32, i32) {
    %c0_i32 = arith.constant 0 : i32
    %c0_i32_0 = arith.constant 0 : i32
    return %arg0, %c0_i32 : i32, i32
  }
}

</mosaic_0001>

<bundles_post_ra>
// kernel: lstm_model_forward.5
= control target key start
LH: loop header
LB: loop body
LE: loop exit
PB: predicated region body
PF: predicated region fallthrough
CT: control target
= control target key end

     0   :  { %8 = vsyncpa [#allocation3], 0  ;;  %s330_s0 = inlined_call_operand.vmem [shape: f32[16,4], index: 0, kind: input, shape index: {}]   ;;  %s331_s1 = inlined_call_operand.hbm [shape: f32[4,128], index: 1, kind: input, shape index: {}]   ;;  %s332_s2 = inlined_call_operand.hbm [shape: f32[1,128], index: 2, kind: input, shape index: {}]   ;;  %s333_s3 = inlined_call_operand.vmem [shape: f32[4,16,32], index: 3, kind: output, shape index: {}]  }
   0x1   :  { %9 = vsyncpa [#allocation5], 0  ;;  %s243_s12 = smov [#allocation2]   ;;  %s244_s14 = smov [#allocation4]  }
   0x2   :  { %s18_s13 = sshll.u32 %s243_s12, 4  ;;  %s28_s15 = sshll.u32 %s244_s14, 4  ;;  %s19_s13 = int_to_ptr.vmem [resolvable:$true] %s18_s13  ;;  %s29_s15 = int_to_ptr.vmem [resolvable:$true] %s28_s15 }
   0x3   :  { %s195_s18 = scalar_lea.hbm %s331_s1, 64 }
   0x4   :  { %p196_p0 = scmp.ne.s32.totalorder %s331_s1, %s195_s18  ;;  %p199_p1 = scmp.lt.u32.totalorder %s195_s18, %s331_s1 }
   0x6   :  { %p201_p2 = pnand %p199_p1, %p196_p0 }
   0x8   :  { %204 = shalt.err (!%p201_p2)
}
   0x9   :  { %s205_s23 = scalar_lea.vmem %s19_s13, 64  ;;  %p210_p4 = scmp.lt.s32.totalorder %s19_s13, %s19_s13 }
   0xa   :  { %p206_p3 = scmp.ne.s32.totalorder %s19_s13, %s205_s23  ;;  %p211_p5 = scmp.lt.s32.totalorder %s205_s23, %s205_s23 }
   0xc   :  { %p212_p6 = por %p211_p5, %p210_p4 }
   0xe   :  { %p213_p7 = pnand %p212_p6, %p206_p3 }
  0x10   :  { %216 = shalt.err (!%p213_p7)
}
  0x11   :  { %21 = dma.hbm_to_vmem [thread:$0]  %s331_s1, 64, %s19_s13, [#allocation3]  }
  0x12   :  { %s217_s28 = scalar_lea.hbm %s332_s2, 16 }
  0x13   :  { %p218_p8 = scmp.ne.s32.totalorder %s332_s2, %s217_s28  ;;  %p221_p9 = scmp.lt.u32.totalorder %s217_s28, %s332_s2 }
  0x15   :  { %p223_p10 = pnand %p221_p9, %p218_p8 }
  0x17   :  { %226 = shalt.err (!%p223_p10)
}
  0x18   :  { %s227_s6 = scalar_lea.vmem %s29_s15, 16  ;;  %s231_s7 = scalar_lea.vmem %s29_s15, 32 }
  0x19   :  { %p228_p11 = scmp.ne.s32.totalorder %s29_s15, %s227_s6  ;;  %p232_p12 = scmp.lt.s32.totalorder %s29_s15, %s29_s15 }
  0x1a   :  { %p233_p13 = scmp.lt.s32.totalorder %s231_s7, %s227_s6 }
  0x1c   :  { %p234_p0 = por %p233_p13, %p232_p12 }
  0x1e   :  { %p235_p1 = pnand %p234_p0, %p228_p11 }
  0x20   :  { %238 = shalt.err (!%p235_p1)
}
  0x21   :  { %31 = dma.hbm_to_vmem [thread:$0]  %s332_s2, 16, %s29_s15, [#allocation5]  }
  0x22   :  { %239 = dma.done.wait [#allocation3], 64  }
  0x23   :  { %240 = vsyncadd [#allocation3], 4294967232 }
  0x24   :  { %241 = dma.done.wait [#allocation5], 16  }
  0x25   :  { %242 = vsyncadd [#allocation5], 4294967280  ;;  %vm55_vm0 = vcmask 1043456   ;;  %vm48_vm1 = vcmask 31744   ;;  %v40_v0 = vld [vmem:[#allocation2] sm:$0xf] }
  0x26   :  { %v38_v1 = vld [vmem:[%s330_s0] sm:$0xff]  ;;  %v39_v2 = vld [vmem:[%s330_s0 + $0x8] sm:$0xff]  ;;  %185 = vmatprep.subr.msk.mxu0 %vm55_vm0, %v40_v0  ;;  %vm134_vm2 = vcmask 261120   ;;  %s245_s14 = smov 64   ;;  %s246_s15 = smov 96  }
  0x27   :  { %187 = vmatprep.mubr.msk.f32.mxu0 %vm48_vm1, %v38_v1  ;;  %186 = vmatpush3.msk.msra.mxu0 %vm55_vm0, %v40_v0  ;;  %v172_v3 = vld [vmem:[#allocation4] ss:$0 sm:$0xff]  ;;  %s247_s17 = smov 32  }
  0x28   :  { %188 = vmatmul.mubr.msk.f32.vlgmr.msra.gmra.mrb[0].mxu0 %vm48_vm1, %v39_v2 }
  0xfb   :  { %v189_v4 = vpop.f32.mrb[0].mxu0 }
  0xfc   :  { %v131_v5 = vadd.f32 %v189_v4, %v172_v3  ;;  %v125_v6 = vpop.f32.mrb[1].mxu0 }
  0xfd   :  { %v126_v7 = vadd.f32 %v172_v3, %v125_v6 }
  0xfe   :  { %136 = vst.msk [vmem:[%s333_s3 + $0x8] sm:$0xff] %vm134_vm2, %v131_v5  ;;  %150 = vrot.lane.b32.xlu1 %v131_v5, %s245_s14  ;;  %141 = vrot.lane.b32.xlu0 %v131_v5, %s246_s15 }
  0xff   :  { %135 = vst.msk [vmem:[%s333_s3] sm:$0xff] %vm134_vm2, %v126_v7 }
 0x102   :  { %148 = vrot.lane.b32.xlu1 %v126_v7, %s245_s14  ;;  %139 = vrot.lane.b32.xlu0 %v126_v7, %s246_s15 }
 0x106   :  { %159 = vrot.lane.b32.xlu1 %v131_v5, %s247_s17  ;;  %157 = vrot.lane.b32.xlu0 %v126_v7, %s247_s17 }
 0x170   :  { %v151_v8 = vpop.permute.xlu1 %150  ;;  %v142_v9 = vpop.permute.xlu0 %141 }
 0x171   :  { %179 = vst.msk [vmem:[%s333_s3 + $0x28] sm:$0xff] %vm134_vm2, %v151_v8  ;;  %177 = vst.msk [vmem:[%s333_s3 + $0x18] sm:$0xff] %vm134_vm2, %v142_v9 }
 0x174   :  { %v149_v10 = vpop.permute.xlu1 %148  ;;  %v140_v11 = vpop.permute.xlu0 %139 }
 0x175   :  { %178 = vst.msk [vmem:[%s333_s3 + $0x20] sm:$0xff] %vm134_vm2, %v149_v10  ;;  %176 = vst.msk [vmem:[%s333_s3 + $0x10] sm:$0xff] %vm134_vm2, %v140_v11 }
 0x178   :  { %v160_v12 = vpop.permute.xlu1 %159  ;;  %v158_v13 = vpop.permute.xlu0 %157 }
 0x179   :  { %181 = vst.msk [vmem:[%s333_s3 + $0x38] sm:$0xff] %vm134_vm2, %v160_v12  ;;  %180 = vst.msk [vmem:[%s333_s3 + $0x30] sm:$0xff] %vm134_vm2, %v158_v13 }
 0x17a   :  { %170 = vsyncpa [#allocation3], 1 }
 0x17b   :  { %171 = vsyncpa [#allocation5], 1 }

// kernel: lstm_model_forward.7
= control target key start
LH: loop header
LB: loop body
LE: loop exit
PB: predicated region body
PF: predicated region fallthrough
CT: control target
= control target key end

     0   :  { %vm27_vm0 = vcmask 261120   ;;  %s181_s27 = smov 64   ;;  %s182_s28 = smov 96   ;;  %s259_s1 = inlined_call_operand.vmem [shape: f32[32,128], index: 1, kind: input, shape index: {}]   ;;  %s260_s0 = inlined_call_operand.vmem [shape: f32[16,32], index: 0, kind: input, shape index: {}]   ;;  %s261_s2 = inlined_call_operand.vmem [shape: f32[1,128], index: 2, kind: input, shape index: {}]   ;;  %s262_s3 = inlined_call_operand.vmem [shape: f32[4,16,32], index: 3, kind: output, shape index: {}]  }
   0x1   :  { %v16_v0 = vld [vmem:[%s259_s1] sm:$0xff]  ;;  %v17_v1 = vld [vmem:[%s259_s1 + $0x8] sm:$0xff]  ;;  %v18_v2 = vld [vmem:[%s259_s1 + $0x10] sm:$0xff] }
   0x2   :  { %v170_v3 = vpack.c.bf16 %v17_v1, %v16_v0  ;;  %v19_v4 = vld [vmem:[%s259_s1 + $0x18] sm:$0xff]  ;;  %v14_v5 = vld [vmem:[%s260_s0] sm:$0xff]  ;;  %v15_v7 = vld [vmem:[%s260_s0 + $0x8] sm:$0xff] }
   0x3   :  { %v174_v6 = vpack.c.bf16 %v19_v4, %v18_v2  ;;  %167 = vmatprep.mubr.msk.f32.mxu0 %vm27_vm0, %v14_v5  ;;  %v144_v8 = vld [vmem:[%s261_s2] ss:$0 sm:$0xff]  ;;  %s183_s2 = smov 32  }
   0x4   :  { %171 = vmatprep.subr.bf16.mxu0 %v170_v3 }
   0x5   :  { %173 = vmatpush3.bf16.msra.mxu0 %v170_v3 }
   0x6   :  { %175 = vmatprep.subr.bf16.mxu0 %v174_v6 }
   0x9   :  { %177 = vmatpush3.bf16.msra.mxu0 %v174_v6 }
   0xc   :  { %168 = vmatmul.mubr.msk.f32.vlgmr.msra.gmra.mrb[0].mxu0 %vm27_vm0, %v15_v7 }
  0xdf   :  { %v169_v9 = vpop.f32.mrb[0].mxu0 }
  0xe0   :  { %v106_v10 = vadd.f32 %v169_v9, %v144_v8  ;;  %v100_v11 = vpop.f32.mrb[1].mxu0 }
  0xe1   :  { %v101_v12 = vadd.f32 %v144_v8, %v100_v11 }
  0xe2   :  { %110 = vst.msk [vmem:[%s262_s3 + $0x8] sm:$0xff] %vm27_vm0, %v106_v10  ;;  %124 = vrot.lane.b32.xlu1 %v106_v10, %s181_s27  ;;  %115 = vrot.lane.b32.xlu0 %v106_v10, %s182_s28 }
  0xe3   :  { %109 = vst.msk [vmem:[%s262_s3] sm:$0xff] %vm27_vm0, %v101_v12 }
  0xe6   :  { %122 = vrot.lane.b32.xlu1 %v101_v12, %s181_s27  ;;  %113 = vrot.lane.b32.xlu0 %v101_v12, %s182_s28 }
  0xea   :  { %133 = vrot.lane.b32.xlu1 %v106_v10, %s183_s2  ;;  %131 = vrot.lane.b32.xlu0 %v101_v12, %s183_s2 }
 0x154   :  { %v125_v13 = vpop.permute.xlu1 %124  ;;  %v116_v14 = vpop.permute.xlu0 %115 }
 0x155   :  { %150 = vst.msk [vmem:[%s262_s3 + $0x28] sm:$0xff] %vm27_vm0, %v125_v13  ;;  %148 = vst.msk [vmem:[%s262_s3 + $0x18] sm:$0xff] %vm27_vm0, %v116_v14 }
 0x158   :  { %v123_v15 = vpop.permute.xlu1 %122  ;;  %v114_v16 = vpop.permute.xlu0 %113 }
 0x159   :  { %149 = vst.msk [vmem:[%s262_s3 + $0x20] sm:$0xff] %vm27_vm0, %v123_v15  ;;  %147 = vst.msk [vmem:[%s262_s3 + $0x10] sm:$0xff] %vm27_vm0, %v114_v16 }
 0x15c   :  { %v134_v17 = vpop.permute.xlu1 %133  ;;  %v132_v18 = vpop.permute.xlu0 %131 }
 0x15d   :  { %152 = vst.msk [vmem:[%s262_s3 + $0x38] sm:$0xff] %vm27_vm0, %v134_v17  ;;  %151 = vst.msk [vmem:[%s262_s3 + $0x30] sm:$0xff] %vm27_vm0, %v132_v18 }

// kernel: lstm_model_forward.9
= control target key start
LH: loop header
LB: loop body
LE: loop exit
PB: predicated region body
PF: predicated region fallthrough
CT: control target
= control target key end

     0   :  { %v329_v3 = vmov 0.0   ;;  %vm42_vm0 = vcmask 261120   ;;  %v32_v63 = vlaneseq  ;;  %vm240_vm1 = vcmask 130048   ;;  %s500_s1 = inlined_call_operand.vmem [shape: f32[32,256], index: 1, kind: input, shape index: {}]   ;;  %s501_s3 = inlined_call_operand.vmem [shape: f32[256,16], index: 3, kind: input, shape index: {}]   ;;  %s502_s0 = inlined_call_operand.vmem [shape: f32[16,32], index: 0, kind: input, shape index: {}]   ;;  %s503_s2 = inlined_call_operand.vmem [shape: f32[1,256], index: 2, kind: input, shape index: {}]   ;;  %s504_s4 = inlined_call_operand.vmem [shape: f32[1,16], index: 4, kind: input, shape index: {}]   ;;  %s505_s5 = inlined_call_operand.vmem [shape: f32[16,16], index: 5, kind: output, shape index: {}]  }
   0x1   :  { %v23_v0 = vld [vmem:[%s500_s1 + $0x8] sm:$0xff]  ;;  %v25_v1 = vld [vmem:[%s500_s1 + $0x18] sm:$0xff]  ;;  %v22_v2 = vld [vmem:[%s500_s1] sm:$0xff]  ;;  %113 = vmatprep.mubr.f32.mxu0 %v329_v3 }
   0x2   :  { %v288_v4 = vpack.c.bf16 %v25_v1, %v23_v0  ;;  %v24_v5 = vld [vmem:[%s500_s1 + $0x10] sm:$0xff]  ;;  %v27_v6 = vld [vmem:[%s500_s1 + $0x28] sm:$0xff]  ;;  %v29_v7 = vld [vmem:[%s500_s1 + $0x38] sm:$0xff]  ;;  %v33_v0 = vshrl.u32 %v32_v63, 7 }
   0x3   :  { %v290_v8 = vpack.c.bf16 %v24_v5, %v22_v2  ;;  %v292_v9 = vpack.c.bf16 %v29_v7, %v27_v6  ;;  %v26_v10 = vld [vmem:[%s500_s1 + $0x20] sm:$0xff]  ;;  %v28_v11 = vld [vmem:[%s500_s1 + $0x30] sm:$0xff]  ;;  %v143_v13 = vld [vmem:[%s501_s3 + $0x88] sm:$0xff] }
   0x4   :  { %289 = vmatprep.subr.bf16.mxu0 %v288_v4  ;;  %v142_v12 = vld [vmem:[%s501_s3 + $0x80] sm:$0xff]  ;;  %v294_v14 = vpack.c.bf16 %v28_v11, %v26_v10  ;;  %v127_v17 = vld [vmem:[%s501_s3 + $0x8] sm:$0xff]  ;;  %v144_v18 = vld [vmem:[%s501_s3 + $0x90] sm:$0xff]  ;;  %v38_v1 = vsub.s32 1, %v33_v0 }
   0x5   :  { %291 = vmatpush1.bf16.msra.mxu0 %v290_v8  ;;  %v296_v15 = vpack.c.bf16 %v143_v13, %v142_v12  ;;  %v126_v16 = vld [vmem:[%s501_s3] sm:$0xff]  ;;  %v145_v20 = vld [vmem:[%s501_s3 + $0x98] sm:$0xff]  ;;  %v128_v21 = vld [vmem:[%s501_s3 + $0x10] sm:$0xff] }
   0x6   :  { %293 = vmatprep.subr.bf16.mxu0 %v292_v9  ;;  %v298_v19 = vpack.c.bf16 %v127_v17, %v126_v16  ;;  %v129_v22 = vld [vmem:[%s501_s3 + $0x18] sm:$0xff]  ;;  %v300_v23 = vpack.c.bf16 %v145_v20, %v144_v18  ;;  %v146_v24 = vld [vmem:[%s501_s3 + $0xa0] sm:$0xff]  ;;  %v147_v25 = vld [vmem:[%s501_s3 + $0xa8] sm:$0xff] }
   0x7   :  { %297 = vmatprep.subr.bf16.mxu1 %v296_v15  ;;  %v302_v26 = vpack.c.bf16 %v129_v22, %v128_v21  ;;  %v20_v27 = vld [vmem:[%s502_s0] sm:$0xff]  ;;  %v304_v28 = vpack.c.bf16 %v147_v25, %v146_v24  ;;  %v131_v30 = vld [vmem:[%s501_s3 + $0x28] sm:$0xff]  ;;  %v148_v31 = vld [vmem:[%s501_s3 + $0xb0] sm:$0xff] }
   0x8   :  { %299 = vmatpush3.bf16.msra.mxu1 %v298_v19  ;;  %v130_v29 = vld [vmem:[%s501_s3 + $0x20] sm:$0xff]  ;;  %v149_v32 = vld [vmem:[%s501_s3 + $0xb8] sm:$0xff]  ;;  %v21_v34 = vld [vmem:[%s502_s0 + $0x8] sm:$0xff] }
   0x9   :  { %295 = vmatpush1.bf16.msra.mxu0 %v294_v14  ;;  %301 = vmatprep.subr.bf16.mxu1 %v300_v23  ;;  %v306_v33 = vpack.c.bf16 %v131_v30, %v130_v29  ;;  %v308_v35 = vpack.c.bf16 %v149_v32, %v148_v31  ;;  %v132_v36 = vld [vmem:[%s501_s3 + $0x30] sm:$0xff]  ;;  %v133_v37 = vld [vmem:[%s501_s3 + $0x38] sm:$0xff]  ;;  %v150_v38 = vld [vmem:[%s501_s3 + $0xc0] sm:$0xff] }
   0xa   :  { %v151_v39 = vld [vmem:[%s501_s3 + $0xc8] sm:$0xff]  ;;  %v310_v40 = vpack.c.bf16 %v133_v37, %v132_v36  ;;  %v134_v42 = vld [vmem:[%s501_s3 + $0x40] sm:$0xff]  ;;  %v152_v44 = vld [vmem:[%s501_s3 + $0xd0] sm:$0xff] }
   0xb   :  { %v312_v41 = vpack.c.bf16 %v151_v39, %v150_v38  ;;  %v135_v43 = vld [vmem:[%s501_s3 + $0x48] sm:$0xff]  ;;  %v153_v45 = vld [vmem:[%s501_s3 + $0xd8] sm:$0xff]  ;;  %v136_v48 = vld [vmem:[%s501_s3 + $0x50] sm:$0xff] }
   0xc   :  { %247 = vmatmul.mubr.msk.f32.vlgmr.msra.gmra.mrb[0].mxu0 %vm42_vm0, %v20_v27  ;;  %303 = vmatpush3.bf16.msra.mxu1 %v302_v26  ;;  %v314_v46 = vpack.c.bf16 %v135_v43, %v134_v42  ;;  %v316_v47 = vpack.c.bf16 %v153_v45, %v152_v44  ;;  %v137_v49 = vld [vmem:[%s501_s3 + $0x58] sm:$0xff]  ;;  %v154_v50 = vld [vmem:[%s501_s3 + $0xe0] sm:$0xff]  ;;  %v155_v51 = vld [vmem:[%s501_s3 + $0xe8] sm:$0xff] }
   0xd   :  { %119 = vmatprep.mubr.f32.mxu0 %v329_v3  ;;  %305 = vmatprep.subr.bf16.mxu1 %v304_v28  ;;  %v318_v52 = vpack.c.bf16 %v137_v49, %v136_v48  ;;  %v320_v53 = vpack.c.bf16 %v155_v51, %v154_v50  ;;  %v138_v54 = vld [vmem:[%s501_s3 + $0x60] sm:$0xff]  ;;  %v139_v55 = vld [vmem:[%s501_s3 + $0x68] sm:$0xff]  ;;  %v156_v57 = vld [vmem:[%s501_s3 + $0xf0] sm:$0xff]  ;;  %v34_v3 = vsub.s32 0, %v33_v0 }
   0xe   :  { %v322_v56 = vpack.c.bf16 %v139_v55, %v138_v54  ;;  %v157_v58 = vld [vmem:[%s501_s3 + $0xf8] sm:$0xff]  ;;  %v140_v60 = vld [vmem:[%s501_s3 + $0x70] sm:$0xff]  ;;  %v30_v2 = vld [vmem:[%s503_s2] sm:$0x3] }
   0xf   :  { %v324_v59 = vpack.c.bf16 %v157_v58, %v156_v57  ;;  %v141_v61 = vld [vmem:[%s501_s3 + $0x78] sm:$0xff]  ;;  %v39_v4 = vrot.slane %v30_v2, %v38_v1  ;;  %v35_v5 = vrot.slane %v30_v2, %v34_v3  ;;  %v249_v15 = vld [vmem:[%s504_s4] ss:$0 sm:$0xff] }
  0x10   :  { %248 = vmatmul.mubr.msk.f32.gmra.mrb[2].mxu0 %vm42_vm0, %v21_v34  ;;  %307 = vmatpush3.bf16.msra.mxu1 %v306_v33  ;;  %v326_v62 = vpack.c.bf16 %v141_v61, %v140_v60 }
  0x11   :  { %309 = vmatprep.subr.bf16.mxu1 %v308_v35 }
  0x14   :  { %311 = vmatpush3.bf16.msra.mxu1 %v310_v40 }
  0x15   :  { %313 = vmatprep.subr.bf16.mxu1 %v312_v41 }
  0x18   :  { %315 = vmatpush3.bf16.msra.mxu1 %v314_v46 }
  0x19   :  { %317 = vmatprep.subr.bf16.mxu1 %v316_v47 }
  0x1c   :  { %319 = vmatpush3.bf16.msra.mxu1 %v318_v52 }
  0x1d   :  { %321 = vmatprep.subr.bf16.mxu1 %v320_v53 }
  0x20   :  { %323 = vmatpush3.bf16.msra.mxu1 %v322_v56 }
  0x21   :  { %325 = vmatprep.subr.bf16.mxu1 %v324_v59 }
  0x24   :  { %327 = vmatpush3.bf16.msra.mxu1 %v326_v62 }
  0xdf   :  { %v115_v6 = vpop.f32.mrb[0].mxu0 }
  0xe0   :  { %v117_v7 = vpop.f32.mrb[1].mxu0  ;;  %v116_v9 = vadd.f32 %v115_v6, %v35_v5 }
  0xe1   :  { %v118_v8 = vadd.f32 %v117_v7, %v39_v4 }
  0xe3   :  { %v121_v10 = vpop.f32.mrb[2].mxu0  ;;  %229 = vmatprep.mubr.f32.mxu1 %v118_v8 }
  0xe4   :  { %v123_v11 = vpop.f32.mrb[3].mxu0  ;;  %230 = vmatmul.mubr.f32.vlgmr.msra.gmra.mrb[0].mxu1 %v116_v9  ;;  %v122_v13 = vadd.f32 %v121_v10, %v35_v5 }
  0xe5   :  { %v124_v12 = vadd.f32 %v123_v11, %v39_v4 }
  0xe7   :  { %234 = vmatprep.mubr.f32.mxu1 %v124_v12 }
  0xe8   :  { %235 = vmatmul.mubr.f32.gmra.mrb[2].mxu1 %v122_v13 }
 0x1b7   :  { %v282_v14 = vpop.f32.mrb[0].mxu1 }
 0x1b8   :  { %v283_v16 = vpop.f32.mrb[1].mxu1 }
 0x1b9   :  { %v284_v17 = vadd.f32 %v283_v16, %v282_v14 }
 0x1bb   :  { %v232_v18 = vadd.f32 %v284_v17, %v249_v15  ;;  %v285_v19 = vpop.f32.mrb[2].mxu1 }
 0x1bc   :  { %v286_v20 = vpop.f32.mrb[3].mxu1 }
 0x1bd   :  { %241 = vst.msk [vmem:[%s505_s5] sm:$0xff] %vm240_vm1, %v232_v18  ;;  %v287_v21 = vadd.f32 %v286_v20, %v285_v19 }
 0x1bf   :  { %v237_v22 = vadd.f32 %v287_v21, %v249_v15 }
 0x1c1   :  { %242 = vst.msk [vmem:[%s505_s5 + $0x8] sm:$0xff] %vm240_vm1, %v237_v22 }

// kernel: lstm_model_forward.6
= control target key start
LH: loop header
LB: loop body
LE: loop exit
PB: predicated region body
PF: predicated region fallthrough
CT: control target
= control target key end

     0   :  { %vm15_vm0 = vcmask 254976   ;;  %v3778_v0 = vmov 0.0|0.0   ;;  %v3779_v4 = vmov 0.0   ;;  %vm3780_vm1 = vmmov 0   ;;  %s4296_s1 = inlined_call_operand.vmem [shape: f32[4,32,32], index: 1, kind: input, shape index: {}]   ;;  %s4297_s0 = inlined_call_operand.vmem [shape: f32[4,8,2,32], index: 0, kind: input, shape index: {}]   ;;  %s4298_s2 = inlined_call_operand.vmem [shape: f32[8,2,32], index: 2, kind: output, shape index: {}]  }
   0x1   :  { %3455 = vmatprep.subr.bf16.mxu0 %v3778_v0  ;;  %3461 = vmatprep.subr.bf16.mxu1 %v3778_v0  ;;  %v21_v1 = vld [vmem:[%s4296_s1] sm:$0xff]  ;;  %v22_v2 = vld [vmem:[%s4296_s1 + $0x8] sm:$0xff]  ;;  %16 = vst.msk [vmem:[#allocation2] sm:$0x3] %vm15_vm0, %v3779_v4  ;;  %17 = vst.msk [vmem:[#allocation3] sm:$0x3] %vm15_vm0, %v3779_v4 }
   0x2   :  { %v2755_v3 = vld [vmem:[%s4296_s1 + $0x20] sm:$0xff]  ;;  %v3811_v5 = vpack.c.bf16 %v22_v2, %v21_v1  ;;  %v2756_v6 = vld [vmem:[%s4296_s1 + $0x28] sm:$0xff]  ;;  %v23_v7 = vld [vmem:[%s4296_s1 + $0x10] sm:$0xff]  ;;  %3111 = vmatprep.mubr.msk.f32.mxu0 %vm3780_vm1, %v3779_v4  ;;  %3122 = vmatprep.mubr.msk.f32.mxu1 %vm3780_vm1, %v3779_v4  ;;  %vm25_vm2 = vcmask 261120  }
   0x3   :  { %v24_v8 = vld [vmem:[%s4296_s1 + $0x18] sm:$0xff]  ;;  %v3826_v9 = vpack.c.bf16 %v2756_v6, %v2755_v3  ;;  %v2757_v10 = vld [vmem:[%s4296_s1 + $0x30] sm:$0xff]  ;;  %v2761_v14 = vld [vmem:[%s4296_s1 + $0x40] sm:$0xff] }
   0x4   :  { %v2758_v11 = vld [vmem:[%s4296_s1 + $0x38] sm:$0xff]  ;;  %3457 = vmatpush3.bf16.msra.mxu0 %v3811_v5  ;;  %v3835_v12 = vpack.c.bf16 %v24_v8, %v23_v7  ;;  %v2762_v15 = vld [vmem:[%s4296_s1 + $0x48] sm:$0xff]  ;;  %v2767_v16 = vld [vmem:[%s4296_s1 + $0x60] sm:$0xff] }
   0x5   :  { %3463 = vmatpush3.bf16.msra.mxu1 %v3826_v9  ;;  %3458 = vmatprep.subr.bf16.mxu0 %v3778_v0  ;;  %v3839_v13 = vpack.c.bf16 %v2758_v11, %v2757_v10  ;;  %v2768_v17 = vld [vmem:[%s4296_s1 + $0x68] sm:$0xff]  ;;  %v3855_v19 = vpack.c.bf16 %v2762_v15, %v2761_v14  ;;  %v2763_v21 = vld [vmem:[%s4296_s1 + $0x50] sm:$0xff]  ;;  %v2764_v22 = vld [vmem:[%s4296_s1 + $0x58] sm:$0xff] }
   0x6   :  { %3464 = vmatprep.subr.bf16.mxu1 %v3778_v0  ;;  %v3859_v20 = vpack.c.bf16 %v2768_v17, %v2767_v16  ;;  %v2769_v23 = vld [vmem:[%s4296_s1 + $0x70] sm:$0xff]  ;;  %v2770_v24 = vld [vmem:[%s4296_s1 + $0x78] sm:$0xff]  ;;  %v3877_v25 = vpack.c.bf16 %v2764_v22, %v2763_v21  ;;  %v20_v27 = vld [vmem:[%s4297_s0] sm:$0x3] }
   0x7   :  { %v3881_v26 = vpack.c.bf16 %v2770_v24, %v2769_v23  ;;  %v2754_v28 = vld [vmem:[%s4297_s0 + $0x10] sm:$0x3]  ;;  %v2760_v39 = vld [vmem:[%s4297_s0 + $0x20] sm:$0x3]  ;;  %v2775_v63 = vld [vmem:[%s4297_s0 + $0x2] sm:$0x3] }
   0x8   :  { %3460 = vmatpush3.bf16.msra.mxu0 %v3835_v12  ;;  %v18_v18 = vld [vmem:[#allocation2] sm:$0x3]  ;;  %v2766_v37 = vld [vmem:[%s4297_s0 + $0x30] sm:$0x3]  ;;  %v19_v52 = vld [vmem:[#allocation3] sm:$0x3] }
   0x9   :  { %3466 = vmatpush3.bf16.msra.mxu1 %v3839_v13  ;;  %3467 = vmatprep.subr.bf16.mxu0 %v3778_v0  ;;  %v2777_v1 = vld [vmem:[%s4297_s0 + $0x12] sm:$0x3]  ;;  %v2783_v23 = vld [vmem:[%s4297_s0 + $0x22] sm:$0x3] }
   0xa   :  { %3473 = vmatprep.subr.bf16.mxu1 %v3778_v0  ;;  %v2789_v15 = vld [vmem:[%s4297_s0 + $0x32] sm:$0x3] }
   0xb   :  { %3112 = vmatmul.mubr.msk.f32.vlgmr.msra.gmra.mrb[0].mxu0 %vm25_vm2, %v18_v18 }
   0xc   :  { %3123 = vmatmul.mubr.msk.f32.vlgmr.msra.gmra.mrb[0].mxu1 %vm25_vm2, %v18_v18  ;;  %3469 = vmatpush3.bf16.msra.mxu0 %v3855_v19 }
   0xd   :  { %3475 = vmatpush3.bf16.msra.mxu1 %v3859_v20  ;;  %3470 = vmatprep.subr.bf16.mxu0 %v3778_v0 }
   0xe   :  { %3476 = vmatprep.subr.bf16.mxu1 %v3778_v0  ;;  %3133 = vmatprep.mubr.msk.f32.mxu0 %vm3780_vm1, %v3779_v4 }
   0xf   :  { %3144 = vmatprep.mubr.msk.f32.mxu1 %vm3780_vm1, %v3779_v4 }
  0x10   :  { %3472 = vmatpush3.bf16.msra.mxu0 %v3877_v25 }
  0x11   :  { %3478 = vmatpush3.bf16.msra.mxu1 %v3881_v26  ;;  %3479 = vmatprep.subr.bf16.mxu0 %v3778_v0 }
  0x12   :  { %3485 = vmatprep.subr.bf16.mxu1 %v3778_v0 }
  0x13   :  { %3134 = vmatmul.mubr.msk.f32.vlgmr.msra.gmra.mrb[2].mxu0 %vm25_vm2, %v18_v18 }
  0x14   :  { %3145 = vmatmul.mubr.msk.f32.vlgmr.msra.gmra.mrb[2].mxu1 %vm25_vm2, %v18_v18  ;;  %3481 = vmatpush3.bf16.msra.mxu0 %v3811_v5 }
  0x15   :  { %3487 = vmatpush3.bf16.msra.mxu1 %v3826_v9  ;;  %3482 = vmatprep.subr.bf16.mxu0 %v3778_v0 }
  0x16   :  { %3488 = vmatprep.subr.bf16.mxu1 %v3778_v0  ;;  %3155 = vmatprep.mubr.msk.f32.mxu0 %vm3780_vm1, %v3779_v4 }
  0x17   :  { %3166 = vmatprep.mubr.msk.f32.mxu1 %vm3780_vm1, %v3779_v4 }
  0x18   :  { %3484 = vmatpush3.bf16.msra.mxu0 %v3835_v12 }
  0x19   :  { %3490 = vmatpush3.bf16.msra.mxu1 %v3839_v13  ;;  %3491 = vmatprep.subr.bf16.mxu0 %v3778_v0 }
  0x1a   :  { %3497 = vmatprep.subr.bf16.mxu1 %v3778_v0 }
  0xde   :  { %v95_v29 = vpop.f32.mrb[0].mxu0 }
  0xdf   :  { %v99_v30 = vadd.f32 %v95_v29, %v20_v27  ;;  %v173_v31 = vpop.f32.mrb[0].mxu1  ;;  %v3113_v32 = vpop.f32.mrb[1].mxu0 }
  0xe0   :  { %v177_v33 = vadd.f32 %v2754_v28, %v173_v31  ;;  %v3124_v34 = vpop.f32.mrb[1].mxu1 }
  0xe1   :  { %v2772_v35 = vmul.f32 -1.442695, %v99_v30 }
  0xe2   :  { %v2773_v36 = vmul.f32 -1.442695, %v177_v33 }
  0xe3   :  { %3650 = vpow2.f32 %v2772_v35 }
  0xe4   :  { %3652 = vpow2.f32 %v2773_v36 }
  0xe6   :  { %v251_v38 = vpop.f32.mrb[2].mxu0 }
  0xe7   :  { %v329_v40 = vpop.f32.mrb[2].mxu1  ;;  %v3135_v41 = vpop.f32.mrb[3].mxu0  ;;  %v255_v44 = vadd.f32 %v2760_v39, %v251_v38 }
  0xe8   :  { %v333_v42 = vadd.f32 %v2766_v37, %v329_v40  ;;  %v3146_v43 = vpop.f32.mrb[3].mxu1 }
  0xea   :  { %v2774_v45 = vmul.f32 -1.442695, %v333_v42 }
  0xec   :  { %3654 = vpow2.f32 %v2774_v45  ;;  %v2799_v45 = vld [vmem:[%s4297_s0 + $0x4] sm:$0x3] }
  0xed   :  { %v3651_v46 = vpop.eup %3650  ;;  %3656 = vtanh.f32 %v255_v44 }
  0xee   :  { %v3653_v47 = vpop.eup %3652  ;;  %v337_v48 = vadd.f32 1.0, %v3651_v46  ;;  %v2801_v46 = vld [vmem:[%s4297_s0 + $0x14] sm:$0x3] }
  0xef   :  { %v343_v49 = vadd.f32 1.0, %v3653_v47 }
  0xf0   :  { %3658 = vrcp.f32 %v337_v48 }
  0xf1   :  { %3660 = vrcp.f32 %v343_v49 }
  0xf6   :  { %v3655_v50 = vpop.eup %3654 }
  0xf7   :  { %v3657_v51 = vpop.eup %3656  ;;  %v350_v54 = vadd.f32 1.0, %v3655_v50 }
  0xf9   :  { %3662 = vrcp.f32 %v350_v54 }
  0xfa   :  { %v3659_v53 = vpop.eup %3658 }
  0xfb   :  { %v3661_v55 = vpop.eup %3660  ;;  %v354_v56 = vmul.f32 %v3659_v53, %v3657_v51 }
  0xfc   :  { %v353_v57 = vmul.f32 %v3661_v55, %v19_v52  ;;  %v2813_v55 = vld [vmem:[%s4297_s0 + $0x34] sm:$0x3] }
  0xfe   :  { %v355_v58 = vadd.f32 %v354_v56, %v353_v57 }
 0x100   :  { %3664 = vtanh.f32 %v355_v58  ;;  %359 = vst.msk [vmem:[#allocation3] sm:$0x3] %vm15_vm0, %v355_v58 }
 0x103   :  { %v3663_v59 = vpop.eup %3662 }
 0x107   :  { %v363_v36 = vld [vmem:[#allocation3] sm:$0x3] }
 0x10a   :  { %v3665_v60 = vpop.eup %3664 }
 0x10b   :  { %v357_v61 = vmul.f32 %v3665_v60, %v3663_v59 }
 0x10d   :  { %360 = vst.msk [vmem:[#allocation2] sm:$0x3] %vm15_vm0, %v357_v61  ;;  %361 = vst.msk [vmem:[%s4298_s2] sm:$0x3] %vm15_vm0, %v357_v61  ;;  %v2807_v61 = vld [vmem:[%s4297_s0 + $0x24] sm:$0x3] }
 0x114   :  { %v362_v62 = vld [vmem:[#allocation2] sm:$0x3] }
 0x115   :  { %3156 = vmatmul.mubr.msk.f32.vlgmr.msra.gmra.mrb[4].mxu0 %vm25_vm2, %v362_v62  ;;  %3167 = vmatmul.mubr.msk.f32.vlgmr.msra.gmra.mrb[4].mxu1 %vm25_vm2, %v362_v62 }
 0x116   :  { %3493 = vmatpush3.bf16.msra.mxu0 %v3855_v19  ;;  %3499 = vmatpush3.bf16.msra.mxu1 %v3859_v20 }
 0x117   :  { %3494 = vmatprep.subr.bf16.mxu0 %v3778_v0  ;;  %3500 = vmatprep.subr.bf16.mxu1 %v3778_v0 }
 0x118   :  { %3177 = vmatprep.mubr.msk.f32.mxu0 %vm3780_vm1, %v3779_v4  ;;  %3188 = vmatprep.mubr.msk.f32.mxu1 %vm3780_vm1, %v3779_v4 }
 0x11a   :  { %3496 = vmatpush3.bf16.msra.mxu0 %v3877_v25  ;;  %3502 = vmatpush3.bf16.msra.mxu1 %v3881_v26 }
 0x11b   :  { %3503 = vmatprep.subr.bf16.mxu0 %v3778_v0  ;;  %3509 = vmatprep.subr.bf16.mxu1 %v3778_v0 }
 0x11d   :  { %3178 = vmatmul.mubr.msk.f32.vlgmr.msra.gmra.mrb[6].mxu0 %vm25_vm2, %v362_v62  ;;  %3189 = vmatmul.mubr.msk.f32.vlgmr.msra.gmra.mrb[6].mxu1 %vm25_vm2, %v362_v62 }
 0x11e   :  { %3505 = vmatpush3.bf16.msra.mxu0 %v3811_v5  ;;  %3511 = vmatpush3.bf16.msra.mxu1 %v3826_v9 }
 0x11f   :  { %3506 = vmatprep.subr.bf16.mxu0 %v3778_v0  ;;  %3512 = vmatprep.subr.bf16.mxu1 %v3778_v0 }
 0x120   :  { %3199 = vmatprep.mubr.msk.f32.mxu0 %vm3780_vm1, %v3779_v4  ;;  %3210 = vmatprep.mubr.msk.f32.mxu1 %vm3780_vm1, %v3779_v4 }
 0x122   :  { %3508 = vmatpush3.bf16.msra.mxu0 %v3835_v12  ;;  %3514 = vmatpush3.bf16.msra.mxu1 %v3839_v13 }
 0x123   :  { %3515 = vmatprep.subr.bf16.mxu0 %v3778_v0  ;;  %3521 = vmatprep.subr.bf16.mxu1 %v3778_v0 }
 0x1e8   :  { %v439_v2 = vpop.f32.mrb[4].mxu0  ;;  %v516_v3 = vpop.f32.mrb[4].mxu1 }
 0x1e9   :  { %v443_v6 = vadd.f32 %v2775_v63, %v439_v2  ;;  %v520_v7 = vadd.f32 %v2777_v1, %v516_v3  ;;  %v3157_v8 = vpop.f32.mrb[5].mxu0  ;;  %v3168_v10 = vpop.f32.mrb[5].mxu1 }
 0x1eb   :  { %v2795_v11 = vmul.f32 -1.442695, %v443_v6  ;;  %v2796_v14 = vmul.f32 -1.442695, %v520_v7 }
 0x1ed   :  { %3666 = vpow2.f32 %v2795_v11 }
 0x1ee   :  { %3668 = vpow2.f32 %v2796_v14 }
 0x1f0   :  { %v593_v16 = vpop.f32.mrb[6].mxu0  ;;  %v670_v17 = vpop.f32.mrb[6].mxu1 }
 0x1f1   :  { %v674_v18 = vadd.f32 %v2789_v15, %v670_v17  ;;  %v3179_v21 = vpop.f32.mrb[7].mxu0  ;;  %v3190_v22 = vpop.f32.mrb[7].mxu1  ;;  %v597_v27 = vadd.f32 %v2783_v23, %v593_v16 }
 0x1f3   :  { %v2797_v24 = vmul.f32 -1.442695, %v674_v18 }
 0x1f5   :  { %3670 = vpow2.f32 %v2797_v24 }
 0x1f6   :  { %3672 = vtanh.f32 %v597_v27  ;;  %v2823_v27 = vld [vmem:[%s4297_s0 + $0x6] sm:$0x3] }
 0x1f7   :  { %v3667_v28 = vpop.eup %3666 }
 0x1f8   :  { %v3669_v29 = vpop.eup %3668  ;;  %v678_v30 = vadd.f32 1.0, %v3667_v28  ;;  %v2825_v28 = vld [vmem:[%s4297_s0 + $0x16] sm:$0x3] }
 0x1f9   :  { %v684_v31 = vadd.f32 1.0, %v3669_v29 }
 0x1fa   :  { %3674 = vrcp.f32 %v678_v30 }
 0x1fb   :  { %3676 = vrcp.f32 %v684_v31 }
 0x1ff   :  { %v3671_v32 = vpop.eup %3670 }
 0x200   :  { %v3673_v33 = vpop.eup %3672  ;;  %v691_v38 = vadd.f32 1.0, %v3671_v32 }
 0x202   :  { %3678 = vrcp.f32 %v691_v38 }
 0x204   :  { %v3675_v34 = vpop.eup %3674 }
 0x205   :  { %v3677_v35 = vpop.eup %3676  ;;  %v695_v37 = vmul.f32 %v3675_v34, %v3673_v33 }
 0x206   :  { %v694_v39 = vmul.f32 %v3677_v35, %v363_v36 }
 0x208   :  { %v696_v40 = vadd.f32 %v695_v37, %v694_v39  ;;  %v2837_v37 = vld [vmem:[%s4297_s0 + $0x36] sm:$0x3] }
 0x20a   :  { %3680 = vtanh.f32 %v696_v40  ;;  %699 = vst.msk [vmem:[#allocation3] sm:$0x3] %vm15_vm0, %v696_v40 }
 0x20c   :  { %v3679_v41 = vpop.eup %3678 }
 0x211   :  { %v704_v14 = vld [vmem:[#allocation3] sm:$0x3] }
 0x214   :  { %v3681_v42 = vpop.eup %3680 }
 0x215   :  { %v698_v43 = vmul.f32 %v3681_v42, %v3679_v41 }
 0x217   :  { %700 = vst.msk [vmem:[#allocation2] sm:$0x3] %vm15_vm0, %v698_v43  ;;  %2798 = vst.msk [vmem:[%s4298_s2 + $0x2] sm:$0x3] %vm15_vm0, %v698_v43  ;;  %v2831_v43 = vld [vmem:[%s4297_s0 + $0x26] sm:$0x3] }
 0x21e   :  { %v703_v44 = vld [vmem:[#allocation2] sm:$0x3] }
 0x21f   :  { %3200 = vmatmul.mubr.msk.f32.vlgmr.msra.gmra.mrb[8].mxu0 %vm25_vm2, %v703_v44  ;;  %3211 = vmatmul.mubr.msk.f32.vlgmr.msra.gmra.mrb[8].mxu1 %vm25_vm2, %v703_v44 }
 0x220   :  { %3517 = vmatpush3.bf16.msra.mxu0 %v3855_v19  ;;  %3523 = vmatpush3.bf16.msra.mxu1 %v3859_v20 }
 0x221   :  { %3518 = vmatprep.subr.bf16.mxu0 %v3778_v0  ;;  %3524 = vmatprep.subr.bf16.mxu1 %v3778_v0 }
 0x222   :  { %3221 = vmatprep.mubr.msk.f32.mxu0 %vm3780_vm1, %v3779_v4  ;;  %3232 = vmatprep.mubr.msk.f32.mxu1 %vm3780_vm1, %v3779_v4 }
 0x224   :  { %3520 = vmatpush3.bf16.msra.mxu0 %v3877_v25  ;;  %3526 = vmatpush3.bf16.msra.mxu1 %v3881_v26 }
 0x225   :  { %3527 = vmatprep.subr.bf16.mxu0 %v3778_v0  ;;  %3533 = vmatprep.subr.bf16.mxu1 %v3778_v0 }
 0x227   :  { %3222 = vmatmul.mubr.msk.f32.vlgmr.msra.gmra.mrb[10].mxu0 %vm25_vm2, %v703_v44  ;;  %3233 = vmatmul.mubr.msk.f32.vlgmr.msra.gmra.mrb[10].mxu1 %vm25_vm2, %v703_v44 }
 0x228   :  { %3529 = vmatpush3.bf16.msra.mxu0 %v3811_v5  ;;  %3535 = vmatpush3.bf16.msra.mxu1 %v3826_v9 }
 0x229   :  { %3530 = vmatprep.subr.bf16.mxu0 %v3778_v0  ;;  %3536 = vmatprep.subr.bf16.mxu1 %v3778_v0 }
 0x22a   :  { %3243 = vmatprep.mubr.msk.f32.mxu0 %vm3780_vm1, %v3779_v4  ;;  %3254 = vmatprep.mubr.msk.f32.mxu1 %vm3780_vm1, %v3779_v4 }
 0x22c   :  { %3532 = vmatpush3.bf16.msra.mxu0 %v3835_v12  ;;  %3538 = vmatpush3.bf16.msra.mxu1 %v3839_v13 }
 0x22d   :  { %3539 = vmatprep.subr.bf16.mxu0 %v3778_v0  ;;  %3545 = vmatprep.subr.bf16.mxu1 %v3778_v0 }
 0x2f2   :  { %v780_v47 = vpop.f32.mrb[8].mxu0  ;;  %v857_v48 = vpop.f32.mrb[8].mxu1 }
 0x2f3   :  { %v784_v49 = vadd.f32 %v2799_v45, %v780_v47  ;;  %v861_v50 = vadd.f32 %v2801_v46, %v857_v48  ;;  %v3201_v51 = vpop.f32.mrb[9].mxu0  ;;  %v3212_v52 = vpop.f32.mrb[9].mxu1 }
 0x2f5   :  { %v2819_v53 = vmul.f32 -1.442695, %v784_v49  ;;  %v2820_v54 = vmul.f32 -1.442695, %v861_v50 }
 0x2f7   :  { %3682 = vpow2.f32 %v2819_v53 }
 0x2f8   :  { %3684 = vpow2.f32 %v2820_v54 }
 0x2fa   :  { %v934_v56 = vpop.f32.mrb[10].mxu0  ;;  %v1011_v57 = vpop.f32.mrb[10].mxu1 }
 0x2fb   :  { %v1015_v58 = vadd.f32 %v2813_v55, %v1011_v57  ;;  %v3223_v59 = vpop.f32.mrb[11].mxu0  ;;  %v3234_v60 = vpop.f32.mrb[11].mxu1  ;;  %v938_v63 = vadd.f32 %v2807_v61, %v934_v56 }
 0x2fd   :  { %v2821_v62 = vmul.f32 -1.442695, %v1015_v58 }
 0x2ff   :  { %3686 = vpow2.f32 %v2821_v62 }
 0x300   :  { %3688 = vtanh.f32 %v938_v63 }
 0x301   :  { %v3683_v1 = vpop.eup %3682 }
 0x302   :  { %v3685_v2 = vpop.eup %3684  ;;  %v1019_v3 = vadd.f32 1.0, %v3683_v1 }
 0x303   :  { %v1025_v6 = vadd.f32 1.0, %v3685_v2 }
 0x304   :  { %3690 = vrcp.f32 %v1019_v3 }
 0x305   :  { %3692 = vrcp.f32 %v1025_v6 }
 0x309   :  { %v3687_v7 = vpop.eup %3686 }
 0x30a   :  { %v3689_v8 = vpop.eup %3688  ;;  %v1032_v16 = vadd.f32 1.0, %v3687_v7 }
 0x30c   :  { %3694 = vrcp.f32 %v1032_v16 }
 0x30e   :  { %v3691_v10 = vpop.eup %3690 }
 0x30f   :  { %v3693_v11 = vpop.eup %3692  ;;  %v1036_v15 = vmul.f32 %v3691_v10, %v3689_v8  ;;  %v2861_v8 = vld [vmem:[%s4297_s0 + $0x38] sm:$0x3] }
 0x310   :  { %v1035_v17 = vmul.f32 %v3693_v11, %v704_v14 }
 0x312   :  { %v1037_v18 = vadd.f32 %v1036_v15, %v1035_v17  ;;  %v2855_v17 = vld [vmem:[%s4297_s0 + $0x28] sm:$0x3] }
 0x314   :  { %3696 = vtanh.f32 %v1037_v18  ;;  %1040 = vst.msk [vmem:[#allocation3] sm:$0x3] %vm15_vm0, %v1037_v18 }
 0x316   :  { %v3695_v21 = vpop.eup %3694 }
 0x31b   :  { %v1045_v54 = vld [vmem:[#allocation3] sm:$0x3] }
 0x31e   :  { %v3697_v22 = vpop.eup %3696 }
 0x31f   :  { %v1039_v23 = vmul.f32 %v3697_v22, %v3695_v21 }
 0x321   :  { %1041 = vst.msk [vmem:[#allocation2] sm:$0x3] %vm15_vm0, %v1039_v23  ;;  %2822 = vst.msk [vmem:[%s4298_s2 + $0x4] sm:$0x3] %vm15_vm0, %v1039_v23 }
 0x328   :  { %v1044_v24 = vld [vmem:[#allocation2] sm:$0x3] }
 0x329   :  { %3244 = vmatmul.mubr.msk.f32.vlgmr.msra.gmra.mrb[12].mxu0 %vm25_vm2, %v1044_v24  ;;  %3255 = vmatmul.mubr.msk.f32.vlgmr.msra.gmra.mrb[12].mxu1 %vm25_vm2, %v1044_v24 }
 0x32a   :  { %3541 = vmatpush3.bf16.msra.mxu0 %v3855_v19  ;;  %3547 = vmatpush3.bf16.msra.mxu1 %v3859_v20 }
 0x32b   :  { %3542 = vmatprep.subr.bf16.mxu0 %v3778_v0  ;;  %3548 = vmatprep.subr.bf16.mxu1 %v3778_v0 }
 0x32c   :  { %3265 = vmatprep.mubr.msk.f32.mxu0 %vm3780_vm1, %v3779_v4  ;;  %3276 = vmatprep.mubr.msk.f32.mxu1 %vm3780_vm1, %v3779_v4 }
 0x32e   :  { %3544 = vmatpush3.bf16.msra.mxu0 %v3877_v25  ;;  %3550 = vmatpush3.bf16.msra.mxu1 %v3881_v26 }
 0x32f   :  { %3551 = vmatprep.subr.bf16.mxu0 %v3778_v0  ;;  %3557 = vmatprep.subr.bf16.mxu1 %v3778_v0 }
 0x331   :  { %3266 = vmatmul.mubr.msk.f32.vlgmr.msra.gmra.mrb[14].mxu0 %vm25_vm2, %v1044_v24  ;;  %3277 = vmatmul.mubr.msk.f32.vlgmr.msra.gmra.mrb[14].mxu1 %vm25_vm2, %v1044_v24 }
 0x332   :  { %3553 = vmatpush3.bf16.msra.mxu0 %v3811_v5  ;;  %3559 = vmatpush3.bf16.msra.mxu1 %v3826_v9 }
 0x333   :  { %3554 = vmatprep.subr.bf16.mxu0 %v3778_v0  ;;  %3560 = vmatprep.subr.bf16.mxu1 %v3778_v0 }
 0x334   :  { %3287 = vmatprep.mubr.msk.f32.mxu0 %vm3780_vm1, %v3779_v4  ;;  %3298 = vmatprep.mubr.msk.f32.mxu1 %vm3780_vm1, %v3779_v4 }
 0x336   :  { %3556 = vmatpush3.bf16.msra.mxu0 %v3835_v12  ;;  %3562 = vmatpush3.bf16.msra.mxu1 %v3839_v13 }
 0x337   :  { %3563 = vmatprep.subr.bf16.mxu0 %v3778_v0  ;;  %3569 = vmatprep.subr.bf16.mxu1 %v3778_v0 }
 0x3fc   :  { %v1121_v29 = vpop.f32.mrb[12].mxu0  ;;  %v1198_v30 = vpop.f32.mrb[12].mxu1 }
 0x3fd   :  { %v1125_v31 = vadd.f32 %v2823_v27, %v1121_v29  ;;  %v1202_v32 = vadd.f32 %v2825_v28, %v1198_v30  ;;  %v3245_v33 = vpop.f32.mrb[13].mxu0  ;;  %v3256_v34 = vpop.f32.mrb[13].mxu1 }
 0x3ff   :  { %v2843_v35 = vmul.f32 -1.442695, %v1125_v31  ;;  %v2844_v36 = vmul.f32 -1.442695, %v1202_v32 }
 0x401   :  { %3698 = vpow2.f32 %v2843_v35 }
 0x402   :  { %3700 = vpow2.f32 %v2844_v36 }
 0x404   :  { %v1275_v38 = vpop.f32.mrb[14].mxu0  ;;  %v1352_v39 = vpop.f32.mrb[14].mxu1 }
 0x405   :  { %v1356_v40 = vadd.f32 %v2837_v37, %v1352_v39  ;;  %v3267_v41 = vpop.f32.mrb[15].mxu0  ;;  %v3278_v42 = vpop.f32.mrb[15].mxu1  ;;  %v1279_v45 = vadd.f32 %v2831_v43, %v1275_v38  ;;  %v2073_v43 = vld [vmem:[%s4296_s1 + $0x10] sm:$0xff] }
 0x406   :  { %v2899_v41 = vld [vmem:[%s4296_s1 + $0x28] sm:$0xff] }
 0x407   :  { %v2845_v44 = vmul.f32 -1.442695, %v1356_v40 }
 0x409   :  { %3702 = vpow2.f32 %v2845_v44  ;;  %v2074_v44 = vld [vmem:[%s4296_s1 + $0x18] sm:$0xff] }
 0x40a   :  { %3704 = vtanh.f32 %v1279_v45  ;;  %v2900_v45 = vld [vmem:[%s4296_s1 + $0x30] sm:$0xff] }
 0x40b   :  { %v3699_v46 = vpop.eup %3698 }
 0x40c   :  { %v3701_v47 = vpop.eup %3700  ;;  %v1360_v48 = vadd.f32 1.0, %v3699_v46  ;;  %v4156_v46 = vpack.c.bf16 %v2074_v44, %v2073_v43 }
 0x40d   :  { %v1366_v49 = vadd.f32 1.0, %v3701_v47  ;;  %v2901_v47 = vld [vmem:[%s4296_s1 + $0x38] sm:$0xff] }
 0x40e   :  { %3706 = vrcp.f32 %v1360_v48  ;;  %v4162_v48 = vpack.c.bf16 %v2901_v47, %v2900_v45  ;;  %v2909_v45 = vld [vmem:[%s4297_s0 + $0x3c] sm:$0x3] }
 0x40f   :  { %3708 = vrcp.f32 %v1366_v49  ;;  %v2871_v49 = vld [vmem:[%s4297_s0 + $0xa] sm:$0x3] }
 0x413   :  { %v3703_v50 = vpop.eup %3702 }
 0x414   :  { %v3705_v51 = vpop.eup %3704  ;;  %v1373_v56 = vadd.f32 1.0, %v3703_v50  ;;  %v2873_v50 = vld [vmem:[%s4297_s0 + $0x1a] sm:$0x3] }
 0x416   :  { %3710 = vrcp.f32 %v1373_v56 }
 0x418   :  { %v3707_v52 = vpop.eup %3706 }
 0x419   :  { %v3709_v53 = vpop.eup %3708  ;;  %v1377_v55 = vmul.f32 %v3707_v52, %v3705_v51 }
 0x41a   :  { %v1376_v57 = vmul.f32 %v3709_v53, %v1045_v54 }
 0x41c   :  { %v1378_v58 = vadd.f32 %v1377_v55, %v1376_v57 }
 0x41e   :  { %3712 = vtanh.f32 %v1378_v58  ;;  %1381 = vst.msk [vmem:[#allocation3] sm:$0x3] %vm15_vm0, %v1378_v58 }
 0x420   :  { %v3711_v59 = vpop.eup %3710 }
 0x425   :  { %v1386_v32 = vld [vmem:[#allocation3] sm:$0x3] }
 0x428   :  { %v3713_v60 = vpop.eup %3712 }
 0x429   :  { %v1380_v61 = vmul.f32 %v3713_v60, %v3711_v59  ;;  %v2885_v59 = vld [vmem:[%s4297_s0 + $0x3a] sm:$0x3] }
 0x42b   :  { %1382 = vst.msk [vmem:[#allocation2] sm:$0x3] %vm15_vm0, %v1380_v61  ;;  %2846 = vst.msk [vmem:[%s4298_s2 + $0x6] sm:$0x3] %vm15_vm0, %v1380_v61 }
 0x432   :  { %v1385_v62 = vld [vmem:[#allocation2] sm:$0x3] }
 0x433   :  { %3288 = vmatmul.mubr.msk.f32.vlgmr.msra.gmra.mrb[16].mxu0 %vm25_vm2, %v1385_v62  ;;  %3299 = vmatmul.mubr.msk.f32.vlgmr.msra.gmra.mrb[16].mxu1 %vm25_vm2, %v1385_v62 }
 0x434   :  { %3565 = vmatpush3.bf16.msra.mxu0 %v3855_v19  ;;  %3571 = vmatpush3.bf16.msra.mxu1 %v3859_v20 }
 0x435   :  { %3566 = vmatprep.subr.bf16.mxu0 %v3778_v0  ;;  %3572 = vmatprep.subr.bf16.mxu1 %v3778_v0 }
 0x436   :  { %3309 = vmatprep.mubr.msk.f32.mxu0 %vm3780_vm1, %v3779_v4  ;;  %3320 = vmatprep.mubr.msk.f32.mxu1 %vm3780_vm1, %v3779_v4 }
 0x438   :  { %3568 = vmatpush3.bf16.msra.mxu0 %v3877_v25  ;;  %3574 = vmatpush3.bf16.msra.mxu1 %v3881_v26 }
 0x439   :  { %3575 = vmatprep.subr.bf16.mxu0 %v3778_v0  ;;  %3581 = vmatprep.subr.bf16.mxu1 %v3778_v0 }
 0x43b   :  { %3310 = vmatmul.mubr.msk.f32.vlgmr.msra.gmra.mrb[18].mxu0 %vm25_vm2, %v1385_v62  ;;  %3321 = vmatmul.mubr.msk.f32.vlgmr.msra.gmra.mrb[18].mxu1 %vm25_vm2, %v1385_v62 }
 0x43c   :  { %3577 = vmatpush3.bf16.msra.mxu0 %v3811_v5  ;;  %3583 = vmatpush3.bf16.msra.mxu1 %v3826_v9  ;;  %v2847_v5 = vld [vmem:[%s4297_s0 + $0x8] sm:$0x3]  ;;  %v2849_v9 = vld [vmem:[%s4297_s0 + $0x18] sm:$0x3] }
 0x43d   :  { %3578 = vmatprep.subr.bf16.mxu0 %v3778_v0  ;;  %3584 = vmatprep.subr.bf16.mxu1 %v3778_v0 }
 0x43e   :  { %3331 = vmatprep.mubr.msk.f32.mxu0 %vm3780_vm1, %v3779_v4  ;;  %3342 = vmatprep.mubr.msk.f32.mxu1 %vm3780_vm1, %v3779_v4 }
 0x440   :  { %3580 = vmatpush3.bf16.msra.mxu0 %v3835_v12  ;;  %3586 = vmatpush3.bf16.msra.mxu1 %v3839_v13 }
 0x441   :  { %3587 = vmatprep.subr.bf16.mxu0 %v3778_v0  ;;  %3593 = vmatprep.subr.bf16.mxu1 %v3778_v0 }
 0x506   :  { %v1462_v63 = vpop.f32.mrb[16].mxu0  ;;  %v1539_v1 = vpop.f32.mrb[16].mxu1 }
 0x507   :  { %v1466_v2 = vadd.f32 %v2847_v5, %v1462_v63  ;;  %v1543_v3 = vadd.f32 %v2849_v9, %v1539_v1  ;;  %v3289_v6 = vpop.f32.mrb[17].mxu0  ;;  %v3300_v12 = vpop.f32.mrb[17].mxu1  ;;  %v2879_v63 = vld [vmem:[%s4297_s0 + $0x2a] sm:$0x3] }
 0x509   :  { %v2867_v7 = vmul.f32 -1.442695, %v1466_v2  ;;  %v2868_v13 = vmul.f32 -1.442695, %v1543_v3 }
 0x50b   :  { %3714 = vpow2.f32 %v2867_v7 }
 0x50c   :  { %3716 = vpow2.f32 %v2868_v13 }
 0x50e   :  { %v1616_v10 = vpop.f32.mrb[18].mxu0  ;;  %v1693_v11 = vpop.f32.mrb[18].mxu1 }
 0x50f   :  { %v1697_v14 = vadd.f32 %v2861_v8, %v1693_v11  ;;  %v3311_v15 = vpop.f32.mrb[19].mxu0  ;;  %v3322_v16 = vpop.f32.mrb[19].mxu1  ;;  %v1620_v21 = vadd.f32 %v2855_v17, %v1616_v10 }
 0x511   :  { %v2869_v18 = vmul.f32 -1.442695, %v1697_v14 }
 0x513   :  { %3718 = vpow2.f32 %v2869_v18 }
 0x514   :  { %3720 = vtanh.f32 %v1620_v21 }
 0x515   :  { %v3715_v22 = vpop.eup %3714 }
 0x516   :  { %v3717_v23 = vpop.eup %3716  ;;  %v1701_v24 = vadd.f32 1.0, %v3715_v22 }
 0x517   :  { %v1707_v27 = vadd.f32 1.0, %v3717_v23 }
 0x518   :  { %3722 = vrcp.f32 %v1701_v24  ;;  %v2904_v24 = vld [vmem:[%s4296_s1 + $0x40] sm:$0xff] }
 0x519   :  { %3724 = vrcp.f32 %v1707_v27  ;;  %v2905_v27 = vld [vmem:[%s4296_s1 + $0x48] sm:$0xff] }
 0x51d   :  { %v3719_v28 = vpop.eup %3718 }
 0x51e   :  { %v3721_v29 = vpop.eup %3720  ;;  %v1714_v34 = vadd.f32 1.0, %v3719_v28  ;;  %v2910_v28 = vld [vmem:[%s4296_s1 + $0x60] sm:$0xff] }
 0x520   :  { %3726 = vrcp.f32 %v1714_v34  ;;  %v2912_v34 = vld [vmem:[%s4296_s1 + $0x70] sm:$0xff] }
 0x522   :  { %v3723_v30 = vpop.eup %3722 }
 0x523   :  { %v3725_v31 = vpop.eup %3724  ;;  %v1718_v33 = vmul.f32 %v3723_v30, %v3721_v29  ;;  %v2911_v29 = vld [vmem:[%s4296_s1 + $0x68] sm:$0xff]  ;;  %v4198_v30 = vpack.c.bf16 %v2905_v27, %v2904_v24 }
 0x524   :  { %v1717_v35 = vmul.f32 %v3725_v31, %v1386_v32  ;;  %v4200_v31 = vpack.c.bf16 %v2911_v29, %v2910_v28  ;;  %v2906_v32 = vld [vmem:[%s4296_s1 + $0x50] sm:$0xff]  ;;  %v2927_v27 = vld [vmem:[%s4297_s0 + $0x2e] sm:$0x3] }
 0x526   :  { %v1719_v36 = vadd.f32 %v1718_v33, %v1717_v35  ;;  %v2907_v33 = vld [vmem:[%s4296_s1 + $0x58] sm:$0xff] }
 0x527   :  { %v2913_v35 = vld [vmem:[%s4296_s1 + $0x78] sm:$0xff] }
 0x528   :  { %3728 = vtanh.f32 %v1719_v36  ;;  %1722 = vst.msk [vmem:[#allocation3] sm:$0x3] %vm15_vm0, %v1719_v36 }
 0x52a   :  { %v3727_v37 = vpop.eup %3726 }
 0x52f   :  { %v1727_v14 = vld [vmem:[#allocation3] sm:$0x3] }
 0x532   :  { %v3729_v38 = vpop.eup %3728 }
 0x533   :  { %v1721_v39 = vmul.f32 %v3729_v38, %v3727_v37  ;;  %v4218_v37 = vpack.c.bf16 %v2907_v33, %v2906_v32  ;;  %v4220_v38 = vpack.c.bf16 %v2913_v35, %v2912_v34 }
 0x535   :  { %2870 = vst.msk [vmem:[%s4298_s2 + $0x8] sm:$0x3] %vm15_vm0, %v1721_v39  ;;  %1723 = vst.msk [vmem:[#allocation2] sm:$0x3] %vm15_vm0, %v1721_v39  ;;  %v2895_v39 = vld [vmem:[%s4297_s0 + $0xc] sm:$0x3] }
 0x53c   :  { %v1726_v40 = vld [vmem:[#allocation2] sm:$0x3] }
 0x53d   :  { %3332 = vmatmul.mubr.msk.f32.vlgmr.msra.gmra.mrb[20].mxu0 %vm25_vm2, %v1726_v40  ;;  %3343 = vmatmul.mubr.msk.f32.vlgmr.msra.gmra.mrb[20].mxu1 %vm25_vm2, %v1726_v40 }
 0x53e   :  { %3589 = vmatpush3.bf16.msra.mxu0 %v3855_v19  ;;  %3595 = vmatpush3.bf16.msra.mxu1 %v3859_v20  ;;  %v2071_v19 = vld [vmem:[%s4296_s1] sm:$0xff]  ;;  %v2072_v20 = vld [vmem:[%s4296_s1 + $0x8] sm:$0xff] }
 0x53f   :  { %3590 = vmatprep.subr.bf16.mxu0 %v3778_v0  ;;  %3596 = vmatprep.subr.bf16.mxu1 %v3778_v0 }
 0x540   :  { %3353 = vmatprep.mubr.msk.f32.mxu0 %vm3780_vm1, %v3779_v4  ;;  %3364 = vmatprep.mubr.msk.f32.mxu1 %vm3780_vm1, %v3779_v4 }
 0x542   :  { %3592 = vmatpush3.bf16.msra.mxu0 %v3877_v25  ;;  %3598 = vmatpush3.bf16.msra.mxu1 %v3881_v26  ;;  %v2898_v25 = vld [vmem:[%s4296_s1 + $0x20] sm:$0xff]  ;;  %v4137_v26 = vpack.c.bf16 %v2072_v20, %v2071_v19 }
 0x543   :  { %3599 = vmatprep.subr.bf16.mxu0 %v3778_v0  ;;  %3605 = vmatprep.subr.bf16.mxu1 %v3778_v0  ;;  %v4142_v42 = vpack.c.bf16 %v2899_v41, %v2898_v25 }
 0x545   :  { %3354 = vmatmul.mubr.msk.f32.vlgmr.msra.gmra.mrb[22].mxu0 %vm25_vm2, %v1726_v40  ;;  %3365 = vmatmul.mubr.msk.f32.vlgmr.msra.gmra.mrb[22].mxu1 %vm25_vm2, %v1726_v40  ;;  %v2897_v40 = vld [vmem:[%s4297_s0 + $0x1c] sm:$0x3] }
 0x546   :  { %3375 = vmatprep.mubr.msk.f32.mxu0 %vm3780_vm1, %v3779_v4  ;;  %3386 = vmatprep.mubr.msk.f32.mxu1 %vm3780_vm1, %v3779_v4 }
 0x547   :  { %3601 = vmatpush3.bf16.msra.mxu0 %v4137_v26  ;;  %3607 = vmatpush3.bf16.msra.mxu1 %v4142_v42 }
 0x548   :  { %3602 = vmatprep.subr.bf16.mxu0 %v3778_v0  ;;  %3608 = vmatprep.subr.bf16.mxu1 %v3778_v0 }
 0x54b   :  { %3604 = vmatpush3.bf16.msra.mxu0 %v4156_v46  ;;  %3610 = vmatpush3.bf16.msra.mxu1 %v4162_v48 }
 0x54c   :  { %3611 = vmatprep.subr.bf16.mxu0 %v3778_v0  ;;  %3617 = vmatprep.subr.bf16.mxu1 %v3778_v0 }
 0x610   :  { %v1803_v51 = vpop.f32.mrb[20].mxu0  ;;  %v1880_v52 = vpop.f32.mrb[20].mxu1 }
 0x611   :  { %v1807_v53 = vadd.f32 %v2871_v49, %v1803_v51  ;;  %v1884_v54 = vadd.f32 %v2873_v50, %v1880_v52  ;;  %v3333_v55 = vpop.f32.mrb[21].mxu0  ;;  %v3344_v56 = vpop.f32.mrb[21].mxu1  ;;  %v2903_v51 = vld [vmem:[%s4297_s0 + $0x2c] sm:$0x3] }
 0x613   :  { %v2891_v57 = vmul.f32 -1.442695, %v1807_v53  ;;  %v2892_v58 = vmul.f32 -1.442695, %v1884_v54 }
 0x615   :  { %3730 = vpow2.f32 %v2891_v57 }
 0x616   :  { %3732 = vpow2.f32 %v2892_v58 }
 0x618   :  { %v1957_v60 = vpop.f32.mrb[22].mxu0  ;;  %v2034_v61 = vpop.f32.mrb[22].mxu1 }
 0x619   :  { %v2038_v62 = vadd.f32 %v2885_v59, %v2034_v61  ;;  %v3355_v5 = vpop.f32.mrb[23].mxu0  ;;  %v3366_v9 = vpop.f32.mrb[23].mxu1  ;;  %v1961_v2 = vadd.f32 %v2879_v63, %v1957_v60 }
 0x61b   :  { %v2893_v1 = vmul.f32 -1.442695, %v2038_v62 }
 0x61d   :  { %3734 = vpow2.f32 %v2893_v1 }
 0x61e   :  { %3736 = vtanh.f32 %v1961_v2 }
 0x61f   :  { %v3731_v3 = vpop.eup %3730 }
 0x620   :  { %v3733_v6 = vpop.eup %3732  ;;  %v2042_v12 = vadd.f32 1.0, %v3731_v3 }
 0x621   :  { %v2048_v7 = vadd.f32 1.0, %v3733_v6 }
 0x622   :  { %3738 = vrcp.f32 %v2042_v12 }
 0x623   :  { %3740 = vrcp.f32 %v2048_v7  ;;  %v2919_v7 = vld [vmem:[%s4297_s0 + $0xe] sm:$0x3] }
 0x627   :  { %v3735_v13 = vpop.eup %3734 }
 0x628   :  { %v3737_v8 = vpop.eup %3736  ;;  %v2055_v16 = vadd.f32 1.0, %v3735_v13 }
 0x62a   :  { %3742 = vrcp.f32 %v2055_v16 }
 0x62c   :  { %v3739_v10 = vpop.eup %3738 }
 0x62d   :  { %v3741_v11 = vpop.eup %3740  ;;  %v2059_v15 = vmul.f32 %v3739_v10, %v3737_v8 }
 0x62e   :  { %v2058_v17 = vmul.f32 %v3741_v11, %v1727_v14 }
 0x630   :  { %v2060_v18 = vadd.f32 %v2059_v15, %v2058_v17  ;;  %v2933_v17 = vld [vmem:[%s4297_s0 + $0x3e] sm:$0x3] }
 0x632   :  { %3744 = vtanh.f32 %v2060_v18  ;;  %2063 = vst.msk [vmem:[#allocation3] sm:$0x3] %vm15_vm0, %v2060_v18 }
 0x634   :  { %v3743_v21 = vpop.eup %3742 }
 0x639   :  { %v2068_v62 = vld [vmem:[#allocation3] sm:$0x3] }
 0x63c   :  { %v3745_v22 = vpop.eup %3744 }
 0x63d   :  { %v2062_v23 = vmul.f32 %v3745_v22, %v3743_v21 }
 0x63f   :  { %2894 = vst.msk [vmem:[%s4298_s2 + $0xa] sm:$0x3] %vm15_vm0, %v2062_v23  ;;  %2064 = vst.msk [vmem:[#allocation2] sm:$0x3] %vm15_vm0, %v2062_v23 }
 0x646   :  { %v2067_v36 = vld [vmem:[#allocation2] sm:$0x3] }
 0x647   :  { %3376 = vmatmul.mubr.msk.f32.vlgmr.msra.gmra.mrb[24].mxu0 %vm25_vm2, %v2067_v36  ;;  %3387 = vmatmul.mubr.msk.f32.vlgmr.msra.gmra.mrb[24].mxu1 %vm25_vm2, %v2067_v36 }
 0x648   :  { %3613 = vmatpush3.bf16.msra.mxu0 %v4198_v30  ;;  %3619 = vmatpush3.bf16.msra.mxu1 %v4200_v31 }
 0x649   :  { %3614 = vmatprep.subr.bf16.mxu0 %v3778_v0  ;;  %3620 = vmatprep.subr.bf16.mxu1 %v3778_v0 }
 0x64a   :  { %3397 = vmatprep.mubr.msk.f32.mxu0 %vm3780_vm1, %v3779_v4  ;;  %3408 = vmatprep.mubr.msk.f32.mxu1 %vm3780_vm1, %v3779_v4 }
 0x64c   :  { %3616 = vmatpush3.bf16.msra.mxu0 %v4218_v37  ;;  %3622 = vmatpush3.bf16.msra.mxu1 %v4220_v38 }
 0x64d   :  { %3623 = vmatprep.subr.bf16.mxu0 %v3778_v0  ;;  %3629 = vmatprep.subr.bf16.mxu1 %v3778_v0 }
 0x64f   :  { %3398 = vmatmul.mubr.msk.f32.vlgmr.msra.gmra.mrb[26].mxu0 %vm25_vm2, %v2067_v36  ;;  %3409 = vmatmul.mubr.msk.f32.vlgmr.msra.gmra.mrb[26].mxu1 %vm25_vm2, %v2067_v36 }
 0x650   :  { %3625 = vmatpush3.bf16.msra.mxu0 %v4137_v26  ;;  %3631 = vmatpush3.bf16.msra.mxu1 %v4142_v42 }
 0x651   :  { %3626 = vmatprep.subr.bf16.mxu0 %v3778_v0  ;;  %3632 = vmatprep.subr.bf16.mxu1 %v3778_v0 }
 0x652   :  { %3419 = vmatprep.mubr.msk.f32.mxu0 %vm3780_vm1, %v3779_v4  ;;  %3430 = vmatprep.mubr.msk.f32.mxu1 %vm3780_vm1, %v3779_v4 }
 0x654   :  { %3628 = vmatpush3.bf16.msra.mxu0 %v4156_v46  ;;  %3634 = vmatpush3.bf16.msra.mxu1 %v4162_v48 }
 0x655   :  { %3635 = vmatprep.subr.bf16.mxu0 %v3778_v0  ;;  %3641 = vmatprep.subr.bf16.mxu1 %v3778_v0 }
 0x71a   :  { %v2144_v19 = vpop.f32.mrb[24].mxu0  ;;  %v2221_v20 = vpop.f32.mrb[24].mxu1 }
 0x71b   :  { %v2148_v25 = vadd.f32 %v2895_v39, %v2144_v19  ;;  %v2225_v26 = vadd.f32 %v2897_v40, %v2221_v20  ;;  %v3377_v41 = vpop.f32.mrb[25].mxu0  ;;  %v3388_v42 = vpop.f32.mrb[25].mxu1 }
 0x71d   :  { %v2915_v43 = vmul.f32 -1.442695, %v2148_v25  ;;  %v2916_v44 = vmul.f32 -1.442695, %v2225_v26 }
 0x71f   :  { %3746 = vpow2.f32 %v2915_v43 }
 0x720   :  { %3748 = vpow2.f32 %v2916_v44 }
 0x722   :  { %v2298_v46 = vpop.f32.mrb[26].mxu0  ;;  %v2375_v47 = vpop.f32.mrb[26].mxu1 }
 0x723   :  { %v2379_v48 = vadd.f32 %v2909_v45, %v2375_v47  ;;  %v3399_v49 = vpop.f32.mrb[27].mxu0  ;;  %v3410_v50 = vpop.f32.mrb[27].mxu1  ;;  %v2302_v53 = vadd.f32 %v2903_v51, %v2298_v46 }
 0x725   :  { %v2917_v52 = vmul.f32 -1.442695, %v2379_v48 }
 0x727   :  { %3750 = vpow2.f32 %v2917_v52 }
 0x728   :  { %3752 = vtanh.f32 %v2302_v53 }
 0x729   :  { %v3747_v54 = vpop.eup %3746 }
 0x72a   :  { %v3749_v55 = vpop.eup %3748  ;;  %v2383_v56 = vadd.f32 1.0, %v3747_v54 }
 0x72b   :  { %v2389_v57 = vadd.f32 1.0, %v3749_v55 }
 0x72c   :  { %3754 = vrcp.f32 %v2383_v56 }
 0x72d   :  { %3756 = vrcp.f32 %v2389_v57 }
 0x731   :  { %v3751_v58 = vpop.eup %3750 }
 0x732   :  { %v3753_v59 = vpop.eup %3752  ;;  %v2396_v9 = vadd.f32 1.0, %v3751_v58 }
 0x734   :  { %3758 = vrcp.f32 %v2396_v9 }
 0x736   :  { %v3755_v60 = vpop.eup %3754 }
 0x737   :  { %v3757_v61 = vpop.eup %3756  ;;  %v2400_v5 = vmul.f32 %v3755_v60, %v3753_v59 }
 0x738   :  { %v2399_v63 = vmul.f32 %v3757_v61, %v2068_v62 }
 0x73a   :  { %v2401_v1 = vadd.f32 %v2400_v5, %v2399_v63 }
 0x73c   :  { %3760 = vtanh.f32 %v2401_v1  ;;  %2404 = vst.msk [vmem:[#allocation3] sm:$0x3] %vm15_vm0, %v2401_v1 }
 0x73e   :  { %v3759_v2 = vpop.eup %3758 }
 0x746   :  { %v3761_v3 = vpop.eup %3760 }
 0x747   :  { %v2403_v6 = vmul.f32 %v3761_v3, %v3759_v2 }
 0x749   :  { %2918 = vst.msk [vmem:[%s4298_s2 + $0xc] sm:$0x3] %vm15_vm0, %v2403_v6  ;;  %2405 = vst.msk [vmem:[#allocation2] sm:$0x3] %vm15_vm0, %v2403_v6 }
 0x750   :  { %v2408_v12 = vld [vmem:[#allocation2] sm:$0x3] }
 0x751   :  { %3420 = vmatmul.mubr.msk.f32.vlgmr.msra.gmra.mrb[28].mxu0 %vm25_vm2, %v2408_v12  ;;  %3431 = vmatmul.mubr.msk.f32.vlgmr.msra.gmra.mrb[28].mxu1 %vm25_vm2, %v2408_v12 }
 0x752   :  { %3637 = vmatpush3.bf16.msra.mxu0 %v4198_v30  ;;  %3643 = vmatpush3.bf16.msra.mxu1 %v4200_v31 }
 0x753   :  { %3638 = vmatprep.subr.bf16.mxu0 %v3778_v0  ;;  %3644 = vmatprep.subr.bf16.mxu1 %v3778_v0  ;;  %v2921_v0 = vld [vmem:[%s4297_s0 + $0x1e] sm:$0x3] }
 0x754   :  { %3441 = vmatprep.mubr.msk.f32.mxu0 %vm3780_vm1, %v3779_v4  ;;  %3452 = vmatprep.mubr.msk.f32.mxu1 %vm3780_vm1, %v3779_v4 }
 0x756   :  { %3640 = vmatpush3.bf16.msra.mxu0 %v4218_v37  ;;  %3646 = vmatpush3.bf16.msra.mxu1 %v4220_v38  ;;  %v2409_v38 = vld [vmem:[#allocation3] sm:$0x3] }
 0x759   :  { %3442 = vmatmul.mubr.msk.f32.vlgmr.msra.gmra.mrb[30].mxu0 %vm25_vm2, %v2408_v12  ;;  %3453 = vmatmul.mubr.msk.f32.vlgmr.msra.gmra.mrb[30].mxu1 %vm25_vm2, %v2408_v12 }
 0x824   :  { %v2485_v13 = vpop.f32.mrb[28].mxu0  ;;  %v2562_v8 = vpop.f32.mrb[28].mxu1 }
 0x825   :  { %v2489_v10 = vadd.f32 %v2919_v7, %v2485_v13  ;;  %v2566_v4 = vadd.f32 %v2921_v0, %v2562_v8  ;;  %v3421_v11 = vpop.f32.mrb[29].mxu0  ;;  %v3432_v14 = vpop.f32.mrb[29].mxu1 }
 0x827   :  { %v2939_v15 = vmul.f32 -1.442695, %v2489_v10  ;;  %v2940_v16 = vmul.f32 -1.442695, %v2566_v4 }
 0x829   :  { %3762 = vpow2.f32 %v2939_v15 }
 0x82a   :  { %3764 = vpow2.f32 %v2940_v16 }
 0x82c   :  { %v2639_v18 = vpop.f32.mrb[30].mxu0  ;;  %v2716_v21 = vpop.f32.mrb[30].mxu1 }
 0x82d   :  { %v2720_v22 = vadd.f32 %v2933_v17, %v2716_v21  ;;  %v3443_v23 = vpop.f32.mrb[31].mxu0  ;;  %v3454_v24 = vpop.f32.mrb[31].mxu1  ;;  %v2643_v29 = vadd.f32 %v2927_v27, %v2639_v18 }
 0x82f   :  { %v2941_v28 = vmul.f32 -1.442695, %v2720_v22 }
 0x831   :  { %3766 = vpow2.f32 %v2941_v28 }
 0x832   :  { %3768 = vtanh.f32 %v2643_v29 }
 0x833   :  { %v3763_v30 = vpop.eup %3762 }
 0x834   :  { %v3765_v31 = vpop.eup %3764  ;;  %v2724_v32 = vadd.f32 1.0, %v3763_v30 }
 0x835   :  { %v2730_v33 = vadd.f32 1.0, %v3765_v31 }
 0x836   :  { %3770 = vrcp.f32 %v2724_v32 }
 0x837   :  { %3772 = vrcp.f32 %v2730_v33 }
 0x83b   :  { %v3767_v34 = vpop.eup %3766 }
 0x83c   :  { %v3769_v35 = vpop.eup %3768  ;;  %v2737_v40 = vadd.f32 1.0, %v3767_v34 }
 0x83e   :  { %3774 = vrcp.f32 %v2737_v40 }
 0x840   :  { %v3771_v36 = vpop.eup %3770 }
 0x841   :  { %v3773_v37 = vpop.eup %3772  ;;  %v2741_v39 = vmul.f32 %v3771_v36, %v3769_v35 }
 0x842   :  { %v2740_v19 = vmul.f32 %v3773_v37, %v2409_v38 }
 0x844   :  { %v2742_v20 = vadd.f32 %v2741_v39, %v2740_v19 }
 0x846   :  { %3776 = vtanh.f32 %v2742_v20  ;;  %2745 = vst.msk [vmem:[#allocation3] sm:$0x3] %vm15_vm0, %v2742_v20 }
 0x848   :  { %v3775_v25 = vpop.eup %3774 }
 0x850   :  { %v3777_v26 = vpop.eup %3776 }
 0x851   :  { %v2744_v41 = vmul.f32 %v3777_v26, %v3775_v25 }
 0x853   :  { %2746 = vst.msk [vmem:[#allocation2] sm:$0x3] %vm15_vm0, %v2744_v41  ;;  %2942 = vst.msk [vmem:[%s4298_s2 + $0xe] sm:$0x3] %vm15_vm0, %v2744_v41 }

</bundles_post_ra>
